<compile_context>
chip_gen: v7x
topology: tpu7x:2x2x1
jax: 0.10.0
libtpu: 0.0.40
codegen_flags: <defaults>
</compile_context>

<pallas_src>
import math
import functools

import jax
import jax.numpy as jnp
from jax.experimental import pallas as pl
from jax.experimental.pallas import tpu as pltpu


def _select_mxu_dtype():
    # bf16 operands halve weight DMA/VMEM and double MXU rate on v6e/v7x.
    # On v5e these K=128, small-M matmuls are nowhere near the bottleneck, so
    # full f32 precision is free there and removes compounding bf16 round-off.
    try:
        kind = jax.devices()[0].device_kind.lower()
    except Exception:
        return jnp.bfloat16
    if "v5 lite" in kind or "v5lite" in kind or "v5e" in kind:
        return jnp.float32
    return jnp.bfloat16


MXU_DTYPE = _select_mxu_dtype()


# ----------------------------------------------------------------------------- #
# Kernel
# ----------------------------------------------------------------------------- #
def _gelu(t):
    # Exact (erf-based) GELU via the Abramowitz & Stegun 7.1.26 erf approximation
    # (|err| < 1.5e-7), rewritten without a sign select:
    #   gelu(t) = relu(t) - 0.5*|t|*poly(u)*exp(-t^2/2),  u = 1/(1 + p*|t|/sqrt(2))
    # The reciprocal uses the EUP approximate path (same slot as the exp), so the
    # remaining work is pure mul/add on the VPU.
    abs_t = jnp.abs(t)
    a = 0.7071067811865476 * abs_t
    u = pl.reciprocal(1.0 + 0.3275911 * a, approx=True)
    poly = ((((1.061405429 * u - 1.453152027) * u + 1.421413741) * u
             - 0.284496736) * u + 0.254829592) * u
    return jnp.maximum(t, 0.0) - 0.5 * abs_t * poly * jnp.exp(-0.5 * t * t)


def block_kernel(x_ref,      # (Rb, WC)        activation band, Rb = images_per_band*H
                 wfused_ref, # (3, WC, WC+WDC) [c_r pointwise | c_d] fused 1x1 (block-diag)
                 bd_ref,     # (3, 1, WDC)     distill biases (tiled over W)
                 wrdw_ref,   # (4, 9, WC)      3x3 depthwise taps (tiled over W, w-masks folded)
                 br_ref,     # (4, 1, WC)      depthwise biases (tiled over W)
                 w4pw_ref,   # (WC, WC)        c4 pointwise (block-diag)
                 w5d_ref,    # (3, WDC, WC)    c5 slices for d1/d2/d3 (block-diag)
                 w5r_ref,    # (WC, WC)        c5 slice for r4 (block-diag)
                 b5_ref,     # (1, WC)         c5 bias (tiled over W)
                 hok_ref,    # (2, Rb, 1)      row masks: [0] "h-1 valid", [1] "h+1 valid"
                 o_ref,      # (Rb, WC)
                 *, C):
    f32 = jnp.float32
    x = x_ref[...]
    R, WC = x.shape

    def mm(t, w):
        # 1x1 conv == lane-dense MXU matmul against a block-diag-expanded weight.
        return jnp.dot(t.astype(MXU_DTYPE), w, preferred_element_type=f32)

    def dw3x3(t, idx):
        # 3x3 depthwise conv, stride 1, padding 1 (cross-correlation, as torch).
        # Horizontal neighbours: lane rolls by +-C (wrap-around killed by the
        # zeroed boundary taps folded into wrdw host-side).  Vertical neighbours:
        # sublane rolls by +-1, cross-image rows killed by the hok row masks.
        w9 = wrdw_ref[idx]                                        # (9, WC)
        t_l = pltpu.roll(t, C, axis=1)                            # t[., w-1]
        t_r = pltpu.roll(t, WC - C, axis=1)                       # t[., w+1]
        h0 = w9[0:1] * t_l + w9[1:2] * t + w9[2:3] * t_r          # ky = 0 row
        h1 = w9[3:4] * t_l + w9[4:5] * t + w9[5:6] * t_r          # ky = 1 row
        h2 = w9[6:7] * t_l + w9[7:8] * t + w9[8:9] * t_r          # ky = 2 row
        out = (pltpu.roll(h0, 1, axis=0) * hok_ref[0]             # row h-1
               + h1
               + pltpu.roll(h2, R - 1, axis=0) * hok_ref[1])      # row h+1
        return out + br_ref[idx]

    def stage(t, idx):
        # One fused MXU matmul per stage: [c{idx}_r pointwise | c{idx}_d], split
        # at the 128-aligned lane boundary WC.  The distilled branch is GELU'd
        # and folded straight into its c5 contribution (never kept live).
        y = mm(t, wfused_ref[idx])                                # (R, WC + WDC)
        d = _gelu(y[:, WC:] + bd_ref[idx])                        # distilled_c{idx}
        c5_part = jnp.dot(d.astype(MXU_DTYPE), w5d_ref[idx],
                          preferred_element_type=f32)
        r = _gelu(dw3x3(y[:, :WC], idx) + t)                      # GELU(BSConv(t) + t)
        return r, c5_part

    r1, acc = stage(x, 0)
    r2, p = stage(r1, 1)
    acc = acc + p
    r3, p = stage(r2, 2)
    acc = acc + p
    r4 = _gelu(dw3x3(mm(r3, w4pw_ref[...]), 3))                   # r_c4 (no residual)
    acc = acc + jnp.dot(r4.astype(MXU_DTYPE), w5r_ref[...],
                        preferred_element_type=f32)
    o_ref[...] = (acc + b5_ref[...]).astype(o_ref.dtype)


# ----------------------------------------------------------------------------- #
# Host-side parameter packing (layout plumbing only)
# ----------------------------------------------------------------------------- #
def pack_params(params, W):
    """Repack the 20 natural parameter arrays into a few stacked, lane-dense
    tensors: 1x1 weights block-diagonal-expanded over W (so the 1x1 conv becomes
    a lane-dense matmul), the two per-stage 1x1s fused along N, per-channel
    vectors tiled over W, horizontal boundary masks folded into the depthwise
    taps, MXU operands cast to MXU_DTYPE."""
    (w1d, b1d, w1r_pw, w1r_dw, b1r,
     w2d, b2d, w2r_pw, w2r_dw, b2r,
     w3d, b3d, w3r_pw, w3r_dw, b3r,
     w4_pw, w4_dw, b4, w5, b5) = params
    nc, dc = w1d.shape
    f = w1r_pw.shape[1]
    if f != nc:
        raise ValueError("Block.forward only type-checks when f == nc "
                         f"(use ratio=1.0); got f={f}, nc={nc}")
    WC = W * nc

    eye = jnp.eye(W, dtype=jnp.float32)
    bdiag = lambda w: jnp.kron(eye, w)                       # (W*ci, W*co), f32
    trow = lambda v: jnp.tile(v.reshape(1, -1), (1, W))      # (1, W*c),   f32

    # Fused [residual-pw | distill] 1x1 weights for stages 1-3 (one matmul each;
    # split point WC is 128-aligned because the residual half comes first).
    wfused = jnp.stack([
        jnp.concatenate([bdiag(w_r), bdiag(w_d)], axis=1)
        for (w_r, w_d) in ((w1r_pw, w1d), (w2r_pw, w2d), (w3r_pw, w3d))
    ]).astype(MXU_DTYPE)                                     # (3, WC, WC+W*dc)
    bd = jnp.stack([trow(b1d), trow(b2d), trow(b3d)])        # (3, 1, W*dc)
    w4pw = bdiag(w4_pw).astype(MXU_DTYPE)                    # (WC, WC)

    # 3x3 depthwise taps, tiled over W, horizontal boundary masks folded in:
    # kx=0 taps (rows 0,3,6) are zero on the w==0 lanes, kx=2 taps (rows 2,5,8)
    # are zero on the w==W-1 lanes, so the kernel's lane rolls need no masking.
    lane = jnp.arange(WC)
    wok_l = (lane >= nc).astype(jnp.float32)                 # "w-1 valid"
    wok_r = (lane < WC - nc).astype(jnp.float32)             # "w+1 valid"
    ones = jnp.ones((WC,), jnp.float32)
    hmask = jnp.stack([wok_l, ones, wok_r] * 3)              # (9, WC)
    dwtaps = lambda w9: jnp.tile(w9, (1, W)) * hmask         # (9, WC), f32
    wrdw = jnp.stack([dwtaps(w) for w in (w1r_dw, w2r_dw, w3r_dw, w4_dw)])  # (4, 9, WC)
    br = jnp.stack([trow(b) for b in (b1r, b2r, b3r, b4)])                  # (4, 1, WC)

    # c5 split by concat-source: [d1 | d2 | d3 | r4] along the input channels.
    w5d = jnp.stack([bdiag(w5[i * dc:(i + 1) * dc])
                     for i in range(3)]).astype(MXU_DTYPE)   # (3, W*dc, WC)
    w5r = bdiag(w5[3 * dc:]).astype(MXU_DTYPE)               # (WC, WC)
    b5t = trow(b5)                                           # (1, WC)
    return wfused, bd, wrdw, br, w4pw, w5d, w5r, b5t


def _band_row_masks(band_rows, H):
    """0/1 per-row masks (identical for every band, bands hold whole images)."""
    row = jnp.arange(band_rows)
    return jnp.stack([
        (row % H != 0).astype(jnp.float32).reshape(band_rows, 1),       # h-1 valid
        (row % H != H - 1).astype(jnp.float32).reshape(band_rows, 1),   # h+1 valid
    ])


def _choose_images_per_band(B, H):
    """Whole-image row bands: grow the matmul M dim toward >=128 rows, but keep
    >=2 bands when B allows so v7x's two TensorCores each take grid steps.
    Band row count must be a multiple of 8 (sublane tile) or cover all rows."""
    target = max(1, 128 // H)
    cap = max(1, B // 2) if B >= 2 else 1
    start = max(1, min(target, cap))
    for n in range(start, 0, -1):
        if B % n == 0 and ((n * H) % 8 == 0 or n == B):
            return n
    return B


# ----------------------------------------------------------------------------- #
# Wrapper
# ----------------------------------------------------------------------------- #
def block_forward(x_nhwc, params, *, images_per_band=None):
    """Forward pass of `Block` on an NHWC input as one fused, banded Pallas kernel."""
    B, H, W, C = x_nhwc.shape
    WC = W * C
    R = B * H
    packed = pack_params(params, W)
    wfused = packed[0]
    WDC = wfused.shape[-1] - WC

    if images_per_band is None:
        images_per_band = _choose_images_per_band(B, H)
    band_rows = images_per_band * H
    num_bands = B // images_per_band
    hok = _band_row_masks(band_rows, H)

    # Lane-dense working layout: (B, H, W, C) -> (B*H, W*C) is a row-major
    # reshape (no transpose); last dim = W*C = 128 for the test shapes.
    x2d = x_nhwc.reshape(R, WC)

    def const_spec(a):
        nd = a.ndim
        return pl.BlockSpec(a.shape, lambda b: (0,) * nd)   # resident weights

    band_spec = pl.BlockSpec((band_rows, WC), lambda b: (b, 0))

    weight_bytes = sum(int(a.size) * int(a.dtype.itemsize) for a in (*packed, hok))
    band_bytes = band_rows * WC * 4
    # double-buffered in/out bands + resident weights + headroom for f32 temps
    vmem_limit = int(min(100 << 20, 2 * weight_bytes + 24 * band_bytes + (8 << 20)))

    mm_flops = 2 * R * (3 * WC * (WC + WDC) + 2 * WC * WC + 3 * WDC * WC)
    vpu_flops = R * (4 * WC * 22 + (3 * WDC + 4 * WC) * 15)
    gelu_elems = R * (3 * WDC + 4 * WC)
    bytes_accessed = 2 * R * WC * 4 + weight_bytes

    out2d = pl.pallas_call(
        functools.partial(block_kernel, C=C),
        out_shape=jax.ShapeDtypeStruct((R, WC), x_nhwc.dtype),
        grid=(num_bands,),
        in_specs=[band_spec,
                  const_spec(packed[0]), const_spec(packed[1]),
                  const_spec(packed[2]), const_spec(packed[3]),
                  const_spec(packed[4]), const_spec(packed[5]),
                  const_spec(packed[6]), const_spec(packed[7]),
                  const_spec(hok)],
        out_specs=band_spec,
        compiler_params=pltpu.CompilerParams(
            dimension_semantics=("parallel",),
            vmem_limit_bytes=vmem_limit),
        cost_estimate=pl.CostEstimate(flops=int(mm_flops + vpu_flops),
                                      transcendentals=int(2 * gelu_elems),
                                      bytes_accessed=int(bytes_accessed)),
    )(x2d, *packed, hok)
    return out2d.reshape(B, H, W, C)


# ----------------------------------------------------------------------------- #
# Deterministic parameter init (synthetic weights; shapes follow Block.__init__)
# ----------------------------------------------------------------------------- #
def init_params(key, nc, dc, f):
    keys = jax.random.split(key, 20)

    def pw_w(k, ci, co):   # stored as (Cin, Cout) == torch weight (co, ci, 1, 1).T
        return jax.random.normal(k, (ci, co), jnp.float32) / math.sqrt(ci)

    def dw_w(k, c):        # (9, C): tap (dy, dx) at row 3*dy + dx, per channel
        return jax.random.normal(k, (9, c), jnp.float32) / 3.0

    def bias(k, c):
        return jax.random.normal(k, (c,), jnp.float32) * 0.1

    return [
        pw_w(keys[0], nc, dc), bias(keys[1], dc),            # c1_d
        pw_w(keys[2], nc, f),                                # c1_r.pw (no bias)
        dw_w(keys[3], f), bias(keys[4], f),                  # c1_r.dw
        pw_w(keys[5], nc, dc), bias(keys[6], dc),            # c2_d
        pw_w(keys[7], nc, f),                                # c2_r.pw
        dw_w(keys[8], f), bias(keys[9], f),                  # c2_r.dw
        pw_w(keys[10], nc, dc), bias(keys[11], dc),          # c3_d
        pw_w(keys[12], nc, f),                               # c3_r.pw
        dw_w(keys[13], f), bias(keys[14], f),                # c3_r.dw
        pw_w(keys[15], nc, f),                               # c4.pw
        dw_w(keys[16], f), bias(keys[17], f),                # c4.dw
        pw_w(keys[18], 3 * dc + f, nc), bias(keys[19], nc),  # c5
    ]


# ----------------------------------------------------------------------------- #
# Pure-JAX reference (NHWC).  The 1x1 convs use the same MXU_DTYPE-operand /
# f32-accumulate contraction as the kernel so the comparison is apples-to-apples.
# ----------------------------------------------------------------------------- #
def _gelu_exact(x):
    return 0.5 * x * (1.0 + jax.lax.erf(x * 0.7071067811865476))


def ref_forward(x, p):
    (w1d, b1d, w1r_pw, w1r_dw, b1r,
     w2d, b2d, w2r_pw, w2r_dw, b2r,
     w3d, b3d, w3r_pw, w3r_dw, b3r,
     w4_pw, w4_dw, b4, w5, b5) = p

    def pw(t, w, b=None):
        y = jnp.einsum('nhwc,cd->nhwd', t.astype(MXU_DTYPE), w.astype(MXU_DTYPE),
                       preferred_element_type=jnp.float32)
        return y + b.reshape(1, 1, 1, -1) if b is not None else y

    def dw(t, w9, b):
        C = t.shape[-1]
        rhs = w9.reshape(3, 3, C)[:, :, None, :]          # HWIO, I = 1 (depthwise)
        y = jax.lax.conv_general_dilated(
            t, rhs, (1, 1), ((1, 1), (1, 1)),
            dimension_numbers=('NHWC', 'HWIO', 'NHWC'),
            feature_group_count=C,
            precision=jax.lax.Precision.HIGHEST)
        return y + b.reshape(1, 1, 1, -1)

    d1 = _gelu_exact(pw(x, w1d, b1d))
    r1 = _gelu_exact(dw(pw(x, w1r_pw), w1r_dw, b1r) + x)
    d2 = _gelu_exact(pw(r1, w2d, b2d))
    r2 = _gelu_exact(dw(pw(r1, w2r_pw), w2r_dw, b2r) + r1)
    d3 = _gelu_exact(pw(r2, w3d, b3d))
    r3 = _gelu_exact(dw(pw(r2, w3r_pw), w3r_dw, b3r) + r2)
    r4 = _gelu_exact(dw(pw(r3, w4_pw), w4_dw, b4))
    cat = jnp.concatenate([d1, d2, d3, r4], axis=-1)
    return pw(cat, w5, b5)


# ----------------------------------------------------------------------------- #
if __name__ == "__main__":
    def run_case(B, nc, H, W, seed):
        dc = nc // 2
        f = nc                           # ratio = 1.0 (forward requires f == nc)
        key = jax.random.PRNGKey(seed)
        kx, kp = jax.random.split(key)
        x = jax.random.normal(kx, (B, H, W, nc), jnp.float32)   # NHWC activations
        params = init_params(kp, nc, dc, f)
        out = jax.block_until_ready(block_forward(x, params))
        assert out.shape == (B, H, W, nc)
        ref = jax.block_until_ready(ref_forward(x, params))
        return float(jnp.max(jnp.abs(out - ref)))

    # Both sides use the same MXU operand dtype with f32 accumulation; remaining
    # differences come from summation order, the erf/reciprocal approximations
    # and (on v6e/v7x) bf16 intermediate roundings amplified through 8 stages.
    tol = 3e-2 if MXU_DTYPE is jnp.bfloat16 else 1.5e-2

    err1 = run_case(2, 8, 16, 16, 0)     # main test shape (2 bands -> megacore)
    err2 = run_case(3, 8, 8, 16, 1)      # H != W, odd batch: boundary-mask check
    if not (err1 < tol and err2 < tol):
        raise AssertionError(
            f"kernel/reference mismatch: errs=({err1}, {err2}), tol={tol}")
    print("KERNEL_OK")
</pallas_src>

<mosaic_0001>
module attributes {stable_mosaic.version = 11 : i64} {
  func.func @block_kernel(%arg0: i32, %arg1: memref<16x128xf32, #tpu.memory_space<vmem>>, %arg2: memref<3x128x192xbf16, #tpu.memory_space<vmem>>, %arg3: memref<3x1x64xf32, #tpu.memory_space<vmem>>, %arg4: memref<4x9x128xf32, #tpu.memory_space<vmem>>, %arg5: memref<4x1x128xf32, #tpu.memory_space<vmem>>, %arg6: memref<128x128xbf16, #tpu.memory_space<vmem>>, %arg7: memref<3x64x128xbf16, #tpu.memory_space<vmem>>, %arg8: memref<128x128xbf16, #tpu.memory_space<vmem>>, %arg9: memref<1x128xf32, #tpu.memory_space<vmem>>, %arg10: memref<2x16x1xf32, #tpu.memory_space<vmem>>, %arg11: memref<16x128xf32, #tpu.memory_space<vmem>>) attributes {dimension_semantics = [#tpu.dimension_semantics<parallel>], iteration_bounds = array<i64: 2>, scalar_prefetch = 0 : i64, scratch_operands = 0 : i64, tpu.core_type = #tpu.core_type<tc>, window_params = [{transform_indices = @transform_0, window_bounds = array<i64: 16, 128>}, {pipeline_mode = #tpu.pipeline_mode<synchronous>, transform_indices = @transform_1, window_bounds = array<i64: 3, 128, 192>}, {pipeline_mode = #tpu.pipeline_mode<synchronous>, transform_indices = @transform_2, window_bounds = array<i64: 3, 1, 64>}, {pipeline_mode = #tpu.pipeline_mode<synchronous>, transform_indices = @transform_3, window_bounds = array<i64: 4, 9, 128>}, {pipeline_mode = #tpu.pipeline_mode<synchronous>, transform_indices = @transform_4, window_bounds = array<i64: 4, 1, 128>}, {pipeline_mode = #tpu.pipeline_mode<synchronous>, transform_indices = @transform_5, window_bounds = array<i64: 128, 128>}, {pipeline_mode = #tpu.pipeline_mode<synchronous>, transform_indices = @transform_6, window_bounds = array<i64: 3, 64, 128>}, {pipeline_mode = #tpu.pipeline_mode<synchronous>, transform_indices = @transform_7, window_bounds = array<i64: 128, 128>}, {pipeline_mode = #tpu.pipeline_mode<synchronous>, transform_indices = @transform_8, window_bounds = array<i64: 1, 128>}, {pipeline_mode = #tpu.pipeline_mode<synchronous>, transform_indices = @transform_9, window_bounds = array<i64: 2, 16, 1>}, {transform_indices = @transform_10, window_bounds = array<i64: 16, 128>}]} {
    %c0 = arith.constant 0 : index
    %c0_0 = arith.constant 0 : index
    %0 = vector.load %arg1[%c0, %c0_0] : memref<16x128xf32, #tpu.memory_space<vmem>>, vector<16x128xf32>
    %c0_1 = arith.constant 0 : index
    %c0_2 = arith.constant 0 : index
    %c0_3 = arith.constant 0 : index
    %1 = vector.load %arg2[%c0_1, %c0_2, %c0_3] : memref<3x128x192xbf16, #tpu.memory_space<vmem>>, vector<1x128x192xbf16>
    %2 = vector.shape_cast %1 : vector<1x128x192xbf16> to vector<128x192xbf16>
    %3 = arith.truncf %0 : vector<16x128xf32> to vector<16x128xbf16>
    %cst = arith.constant dense<0.000000e+00> : vector<16x192xf32>
    %4 = tpu.matmul %3, %2, %cst {dimension_numbers = #tpu.dot_dimension_numbers<[1], [0], [0], [1], [0, 0, 1, 1], [], []>} : vector<16x128xbf16>, vector<128x192xbf16>, vector<16x192xf32> -> vector<16x192xf32>
    %5 = vector.extract_strided_slice %4 {offsets = [0, 128], sizes = [16, 64], strides = [1, 1]} : vector<16x192xf32> to vector<16x64xf32>
    %c0_4 = arith.constant 0 : index
    %c0_5 = arith.constant 0 : index
    %c0_6 = arith.constant 0 : index
    %6 = vector.load %arg3[%c0_4, %c0_5, %c0_6] : memref<3x1x64xf32, #tpu.memory_space<vmem>>, vector<1x1x64xf32>
    %7 = vector.shape_cast %6 : vector<1x1x64xf32> to vector<1x64xf32>
    %8 = vector.broadcast %7 : vector<1x64xf32> to vector<16x64xf32>
    %9 = arith.addf %5, %8 : vector<16x64xf32>
    %10 = math.absf %9 : vector<16x64xf32>
    %cst_7 = arith.constant 0.707106769 : f32
    %11 = vector.broadcast %cst_7 : f32 to vector<16x64xf32>
    %12 = arith.mulf %11, %10 : vector<16x64xf32>
    %cst_8 = arith.constant 0.327591091 : f32
    %13 = vector.broadcast %cst_8 : f32 to vector<16x64xf32>
    %14 = arith.mulf %13, %12 : vector<16x64xf32>
    %cst_9 = arith.constant 1.000000e+00 : f32
    %15 = vector.broadcast %cst_9 : f32 to vector<16x64xf32>
    %16 = arith.addf %15, %14 : vector<16x64xf32>
    %17 = tpu.reciprocal %16 {approx = true} : vector<16x64xf32> -> vector<16x64xf32>
    %cst_10 = arith.constant 1.06140542 : f32
    %18 = vector.broadcast %cst_10 : f32 to vector<16x64xf32>
    %19 = arith.mulf %18, %17 : vector<16x64xf32>
    %cst_11 = arith.constant 1.45315206 : f32
    %20 = vector.broadcast %cst_11 : f32 to vector<16x64xf32>
    %21 = arith.subf %19, %20 : vector<16x64xf32>
    %22 = arith.mulf %21, %17 : vector<16x64xf32>
    %cst_12 = arith.constant 1.42141378 : f32
    %23 = vector.broadcast %cst_12 : f32 to vector<16x64xf32>
    %24 = arith.addf %22, %23 : vector<16x64xf32>
    %25 = arith.mulf %24, %17 : vector<16x64xf32>
    %cst_13 = arith.constant 0.284496725 : f32
    %26 = vector.broadcast %cst_13 : f32 to vector<16x64xf32>
    %27 = arith.subf %25, %26 : vector<16x64xf32>
    %28 = arith.mulf %27, %17 : vector<16x64xf32>
    %cst_14 = arith.constant 0.254829586 : f32
    %29 = vector.broadcast %cst_14 : f32 to vector<16x64xf32>
    %30 = arith.addf %28, %29 : vector<16x64xf32>
    %31 = arith.mulf %30, %17 : vector<16x64xf32>
    %cst_15 = arith.constant 0.000000e+00 : f32
    %32 = vector.broadcast %cst_15 : f32 to vector<16x64xf32>
    %33 = arith.maximumf %9, %32 : vector<16x64xf32>
    %cst_16 = arith.constant 5.000000e-01 : f32
    %34 = vector.broadcast %cst_16 : f32 to vector<16x64xf32>
    %35 = arith.mulf %34, %10 : vector<16x64xf32>
    %36 = arith.mulf %35, %31 : vector<16x64xf32>
    %cst_17 = arith.constant -5.000000e-01 : f32
    %37 = vector.broadcast %cst_17 : f32 to vector<16x64xf32>
    %38 = arith.mulf %37, %9 : vector<16x64xf32>
    %39 = arith.mulf %38, %9 : vector<16x64xf32>
    %40 = math.exp %39 : vector<16x64xf32>
    %41 = arith.mulf %36, %40 : vector<16x64xf32>
    %42 = arith.subf %33, %41 : vector<16x64xf32>
    %43 = arith.truncf %42 : vector<16x64xf32> to vector<16x64xbf16>
    %c0_18 = arith.constant 0 : index
    %c0_19 = arith.constant 0 : index
    %c0_20 = arith.constant 0 : index
    %44 = vector.load %arg7[%c0_18, %c0_19, %c0_20] : memref<3x64x128xbf16, #tpu.memory_space<vmem>>, vector<1x64x128xbf16>
    %45 = vector.shape_cast %44 : vector<1x64x128xbf16> to vector<64x128xbf16>
    %cst_21 = arith.constant dense<0.000000e+00> : vector<16x128xf32>
    %46 = tpu.matmul %43, %45, %cst_21 {dimension_numbers = #tpu.dot_dimension_numbers<[1], [0], [0], [1], [0, 0, 1, 1], [], []>} : vector<16x64xbf16>, vector<64x128xbf16>, vector<16x128xf32> -> vector<16x128xf32>
    %47 = vector.extract_strided_slice %4 {offsets = [0, 0], sizes = [16, 128], strides = [1, 1]} : vector<16x192xf32> to vector<16x128xf32>
    %c0_22 = arith.constant 0 : index
    %c0_23 = arith.constant 0 : index
    %c0_24 = arith.constant 0 : index
    %48 = vector.load %arg4[%c0_22, %c0_23, %c0_24] : memref<4x9x128xf32, #tpu.memory_space<vmem>>, vector<1x9x128xf32>
    %49 = vector.shape_cast %48 : vector<1x9x128xf32> to vector<9x128xf32>
    %c8_i32 = arith.constant 8 : i32
    %50 = tpu.dynamic_rotate %47 by %c8_i32 dim 1 : vector<16x128xf32>, i32 -> vector<16x128xf32>
    %c120_i32 = arith.constant 120 : i32
    %51 = tpu.dynamic_rotate %47 by %c120_i32 dim 1 : vector<16x128xf32>, i32 -> vector<16x128xf32>
    %52 = vector.extract_strided_slice %49 {offsets = [0, 0], sizes = [1, 128], strides = [1, 1]} : vector<9x128xf32> to vector<1x128xf32>
    %53 = vector.broadcast %52 : vector<1x128xf32> to vector<16x128xf32>
    %54 = arith.mulf %53, %50 : vector<16x128xf32>
    %55 = vector.extract_strided_slice %49 {offsets = [1, 0], sizes = [1, 128], strides = [1, 1]} : vector<9x128xf32> to vector<1x128xf32>
    %56 = vector.broadcast %55 : vector<1x128xf32> to vector<16x128xf32>
    %57 = arith.mulf %56, %47 : vector<16x128xf32>
    %58 = arith.addf %54, %57 : vector<16x128xf32>
    %59 = vector.extract_strided_slice %49 {offsets = [2, 0], sizes = [1, 128], strides = [1, 1]} : vector<9x128xf32> to vector<1x128xf32>
    %60 = vector.broadcast %59 : vector<1x128xf32> to vector<16x128xf32>
    %61 = arith.mulf %60, %51 : vector<16x128xf32>
    %62 = arith.addf %58, %61 : vector<16x128xf32>
    %63 = vector.extract_strided_slice %49 {offsets = [3, 0], sizes = [1, 128], strides = [1, 1]} : vector<9x128xf32> to vector<1x128xf32>
    %64 = vector.broadcast %63 : vector<1x128xf32> to vector<16x128xf32>
    %65 = arith.mulf %64, %50 : vector<16x128xf32>
    %66 = vector.extract_strided_slice %49 {offsets = [4, 0], sizes = [1, 128], strides = [1, 1]} : vector<9x128xf32> to vector<1x128xf32>
    %67 = vector.broadcast %66 : vector<1x128xf32> to vector<16x128xf32>
    %68 = arith.mulf %67, %47 : vector<16x128xf32>
    %69 = arith.addf %65, %68 : vector<16x128xf32>
    %70 = vector.extract_strided_slice %49 {offsets = [5, 0], sizes = [1, 128], strides = [1, 1]} : vector<9x128xf32> to vector<1x128xf32>
    %71 = vector.broadcast %70 : vector<1x128xf32> to vector<16x128xf32>
    %72 = arith.mulf %71, %51 : vector<16x128xf32>
    %73 = arith.addf %69, %72 : vector<16x128xf32>
    %74 = vector.extract_strided_slice %49 {offsets = [6, 0], sizes = [1, 128], strides = [1, 1]} : vector<9x128xf32> to vector<1x128xf32>
    %75 = vector.broadcast %74 : vector<1x128xf32> to vector<16x128xf32>
    %76 = arith.mulf %75, %50 : vector<16x128xf32>
    %77 = vector.extract_strided_slice %49 {offsets = [7, 0], sizes = [1, 128], strides = [1, 1]} : vector<9x128xf32> to vector<1x128xf32>
    %78 = vector.broadcast %77 : vector<1x128xf32> to vector<16x128xf32>
    %79 = arith.mulf %78, %47 : vector<16x128xf32>
    %80 = arith.addf %76, %79 : vector<16x128xf32>
    %81 = vector.extract_strided_slice %49 {offsets = [8, 0], sizes = [1, 128], strides = [1, 1]} : vector<9x128xf32> to vector<1x128xf32>
    %82 = vector.broadcast %81 : vector<1x128xf32> to vector<16x128xf32>
    %83 = arith.mulf %82, %51 : vector<16x128xf32>
    %84 = arith.addf %80, %83 : vector<16x128xf32>
    %c1_i32 = arith.constant 1 : i32
    %85 = tpu.dynamic_rotate %62 by %c1_i32 dim 0 : vector<16x128xf32>, i32 -> vector<16x128xf32>
    %c0_25 = arith.constant 0 : index
    %c0_26 = arith.constant 0 : index
    %c0_27 = arith.constant 0 : index
    %86 = vector.load %arg10[%c0_25, %c0_26, %c0_27] : memref<2x16x1xf32, #tpu.memory_space<vmem>>, vector<1x16x1xf32>
    %87 = vector.shape_cast %86 : vector<1x16x1xf32> to vector<16x1xf32>
    %88 = vector.broadcast %87 : vector<16x1xf32> to vector<16x128xf32>
    %89 = arith.mulf %85, %88 : vector<16x128xf32>
    %90 = arith.addf %89, %73 : vector<16x128xf32>
    %c15_i32 = arith.constant 15 : i32
    %91 = tpu.dynamic_rotate %84 by %c15_i32 dim 0 : vector<16x128xf32>, i32 -> vector<16x128xf32>
    %c1 = arith.constant 1 : index
    %c0_28 = arith.constant 0 : index
    %c0_29 = arith.constant 0 : index
    %92 = vector.load %arg10[%c1, %c0_28, %c0_29] : memref<2x16x1xf32, #tpu.memory_space<vmem>>, vector<1x16x1xf32>
    %93 = vector.shape_cast %92 : vector<1x16x1xf32> to vector<16x1xf32>
    %94 = vector.broadcast %93 : vector<16x1xf32> to vector<16x128xf32>
    %95 = arith.mulf %91, %94 : vector<16x128xf32>
    %96 = arith.addf %90, %95 : vector<16x128xf32>
    %c0_30 = arith.constant 0 : index
    %c0_31 = arith.constant 0 : index
    %c0_32 = arith.constant 0 : index
    %97 = vector.load %arg5[%c0_30, %c0_31, %c0_32] : memref<4x1x128xf32, #tpu.memory_space<vmem>>, vector<1x1x128xf32>
    %98 = vector.shape_cast %97 : vector<1x1x128xf32> to vector<1x128xf32>
    %99 = vector.broadcast %98 : vector<1x128xf32> to vector<16x128xf32>
    %100 = arith.addf %96, %99 : vector<16x128xf32>
    %101 = arith.addf %100, %0 : vector<16x128xf32>
    %102 = math.absf %101 : vector<16x128xf32>
    %cst_33 = arith.constant 0.707106769 : f32
    %103 = vector.broadcast %cst_33 : f32 to vector<16x128xf32>
    %104 = arith.mulf %103, %102 : vector<16x128xf32>
    %cst_34 = arith.constant 0.327591091 : f32
    %105 = vector.broadcast %cst_34 : f32 to vector<16x128xf32>
    %106 = arith.mulf %105, %104 : vector<16x128xf32>
    %cst_35 = arith.constant 1.000000e+00 : f32
    %107 = vector.broadcast %cst_35 : f32 to vector<16x128xf32>
    %108 = arith.addf %107, %106 : vector<16x128xf32>
    %109 = tpu.reciprocal %108 {approx = true} : vector<16x128xf32> -> vector<16x128xf32>
    %cst_36 = arith.constant 1.06140542 : f32
    %110 = vector.broadcast %cst_36 : f32 to vector<16x128xf32>
    %111 = arith.mulf %110, %109 : vector<16x128xf32>
    %cst_37 = arith.constant 1.45315206 : f32
    %112 = vector.broadcast %cst_37 : f32 to vector<16x128xf32>
    %113 = arith.subf %111, %112 : vector<16x128xf32>
    %114 = arith.mulf %113, %109 : vector<16x128xf32>
    %cst_38 = arith.constant 1.42141378 : f32
    %115 = vector.broadcast %cst_38 : f32 to vector<16x128xf32>
    %116 = arith.addf %114, %115 : vector<16x128xf32>
    %117 = arith.mulf %116, %109 : vector<16x128xf32>
    %cst_39 = arith.constant 0.284496725 : f32
    %118 = vector.broadcast %cst_39 : f32 to vector<16x128xf32>
    %119 = arith.subf %117, %118 : vector<16x128xf32>
    %120 = arith.mulf %119, %109 : vector<16x128xf32>
    %cst_40 = arith.constant 0.254829586 : f32
    %121 = vector.broadcast %cst_40 : f32 to vector<16x128xf32>
    %122 = arith.addf %120, %121 : vector<16x128xf32>
    %123 = arith.mulf %122, %109 : vector<16x128xf32>
    %cst_41 = arith.constant 0.000000e+00 : f32
    %124 = vector.broadcast %cst_41 : f32 to vector<16x128xf32>
    %125 = arith.maximumf %101, %124 : vector<16x128xf32>
    %cst_42 = arith.constant 5.000000e-01 : f32
    %126 = vector.broadcast %cst_42 : f32 to vector<16x128xf32>
    %127 = arith.mulf %126, %102 : vector<16x128xf32>
    %128 = arith.mulf %127, %123 : vector<16x128xf32>
    %cst_43 = arith.constant -5.000000e-01 : f32
    %129 = vector.broadcast %cst_43 : f32 to vector<16x128xf32>
    %130 = arith.mulf %129, %101 : vector<16x128xf32>
    %131 = arith.mulf %130, %101 : vector<16x128xf32>
    %132 = math.exp %131 : vector<16x128xf32>
    %133 = arith.mulf %128, %132 : vector<16x128xf32>
    %134 = arith.subf %125, %133 : vector<16x128xf32>
    %c1_44 = arith.constant 1 : index
    %c0_45 = arith.constant 0 : index
    %c0_46 = arith.constant 0 : index
    %135 = vector.load %arg2[%c1_44, %c0_45, %c0_46] : memref<3x128x192xbf16, #tpu.memory_space<vmem>>, vector<1x128x192xbf16>
    %136 = vector.shape_cast %135 : vector<1x128x192xbf16> to vector<128x192xbf16>
    %137 = arith.truncf %134 : vector<16x128xf32> to vector<16x128xbf16>
    %cst_47 = arith.constant dense<0.000000e+00> : vector<16x192xf32>
    %138 = tpu.matmul %137, %136, %cst_47 {dimension_numbers = #tpu.dot_dimension_numbers<[1], [0], [0], [1], [0, 0, 1, 1], [], []>} : vector<16x128xbf16>, vector<128x192xbf16>, vector<16x192xf32> -> vector<16x192xf32>
    %139 = vector.extract_strided_slice %138 {offsets = [0, 128], sizes = [16, 64], strides = [1, 1]} : vector<16x192xf32> to vector<16x64xf32>
    %c1_48 = arith.constant 1 : index
    %c0_49 = arith.constant 0 : index
    %c0_50 = arith.constant 0 : index
    %140 = vector.load %arg3[%c1_48, %c0_49, %c0_50] : memref<3x1x64xf32, #tpu.memory_space<vmem>>, vector<1x1x64xf32>
    %141 = vector.shape_cast %140 : vector<1x1x64xf32> to vector<1x64xf32>
    %142 = vector.broadcast %141 : vector<1x64xf32> to vector<16x64xf32>
    %143 = arith.addf %139, %142 : vector<16x64xf32>
    %144 = math.absf %143 : vector<16x64xf32>
    %cst_51 = arith.constant 0.707106769 : f32
    %145 = vector.broadcast %cst_51 : f32 to vector<16x64xf32>
    %146 = arith.mulf %145, %144 : vector<16x64xf32>
    %cst_52 = arith.constant 0.327591091 : f32
    %147 = vector.broadcast %cst_52 : f32 to vector<16x64xf32>
    %148 = arith.mulf %147, %146 : vector<16x64xf32>
    %cst_53 = arith.constant 1.000000e+00 : f32
    %149 = vector.broadcast %cst_53 : f32 to vector<16x64xf32>
    %150 = arith.addf %149, %148 : vector<16x64xf32>
    %151 = tpu.reciprocal %150 {approx = true} : vector<16x64xf32> -> vector<16x64xf32>
    %cst_54 = arith.constant 1.06140542 : f32
    %152 = vector.broadcast %cst_54 : f32 to vector<16x64xf32>
    %153 = arith.mulf %152, %151 : vector<16x64xf32>
    %cst_55 = arith.constant 1.45315206 : f32
    %154 = vector.broadcast %cst_55 : f32 to vector<16x64xf32>
    %155 = arith.subf %153, %154 : vector<16x64xf32>
    %156 = arith.mulf %155, %151 : vector<16x64xf32>
    %cst_56 = arith.constant 1.42141378 : f32
    %157 = vector.broadcast %cst_56 : f32 to vector<16x64xf32>
    %158 = arith.addf %156, %157 : vector<16x64xf32>
    %159 = arith.mulf %158, %151 : vector<16x64xf32>
    %cst_57 = arith.constant 0.284496725 : f32
    %160 = vector.broadcast %cst_57 : f32 to vector<16x64xf32>
    %161 = arith.subf %159, %160 : vector<16x64xf32>
    %162 = arith.mulf %161, %151 : vector<16x64xf32>
    %cst_58 = arith.constant 0.254829586 : f32
    %163 = vector.broadcast %cst_58 : f32 to vector<16x64xf32>
    %164 = arith.addf %162, %163 : vector<16x64xf32>
    %165 = arith.mulf %164, %151 : vector<16x64xf32>
    %cst_59 = arith.constant 0.000000e+00 : f32
    %166 = vector.broadcast %cst_59 : f32 to vector<16x64xf32>
    %167 = arith.maximumf %143, %166 : vector<16x64xf32>
    %cst_60 = arith.constant 5.000000e-01 : f32
    %168 = vector.broadcast %cst_60 : f32 to vector<16x64xf32>
    %169 = arith.mulf %168, %144 : vector<16x64xf32>
    %170 = arith.mulf %169, %165 : vector<16x64xf32>
    %cst_61 = arith.constant -5.000000e-01 : f32
    %171 = vector.broadcast %cst_61 : f32 to vector<16x64xf32>
    %172 = arith.mulf %171, %143 : vector<16x64xf32>
    %173 = arith.mulf %172, %143 : vector<16x64xf32>
    %174 = math.exp %173 : vector<16x64xf32>
    %175 = arith.mulf %170, %174 : vector<16x64xf32>
    %176 = arith.subf %167, %175 : vector<16x64xf32>
    %177 = arith.truncf %176 : vector<16x64xf32> to vector<16x64xbf16>
    %c1_62 = arith.constant 1 : index
    %c0_63 = arith.constant 0 : index
    %c0_64 = arith.constant 0 : index
    %178 = vector.load %arg7[%c1_62, %c0_63, %c0_64] : memref<3x64x128xbf16, #tpu.memory_space<vmem>>, vector<1x64x128xbf16>
    %179 = vector.shape_cast %178 : vector<1x64x128xbf16> to vector<64x128xbf16>
    %cst_65 = arith.constant dense<0.000000e+00> : vector<16x128xf32>
    %180 = tpu.matmul %177, %179, %cst_65 {dimension_numbers = #tpu.dot_dimension_numbers<[1], [0], [0], [1], [0, 0, 1, 1], [], []>} : vector<16x64xbf16>, vector<64x128xbf16>, vector<16x128xf32> -> vector<16x128xf32>
    %181 = vector.extract_strided_slice %138 {offsets = [0, 0], sizes = [16, 128], strides = [1, 1]} : vector<16x192xf32> to vector<16x128xf32>
    %c1_66 = arith.constant 1 : index
    %c0_67 = arith.constant 0 : index
    %c0_68 = arith.constant 0 : index
    %182 = vector.load %arg4[%c1_66, %c0_67, %c0_68] : memref<4x9x128xf32, #tpu.memory_space<vmem>>, vector<1x9x128xf32>
    %183 = vector.shape_cast %182 : vector<1x9x128xf32> to vector<9x128xf32>
    %c8_i32_69 = arith.constant 8 : i32
    %184 = tpu.dynamic_rotate %181 by %c8_i32_69 dim 1 : vector<16x128xf32>, i32 -> vector<16x128xf32>
    %c120_i32_70 = arith.constant 120 : i32
    %185 = tpu.dynamic_rotate %181 by %c120_i32_70 dim 1 : vector<16x128xf32>, i32 -> vector<16x128xf32>
    %186 = vector.extract_strided_slice %183 {offsets = [0, 0], sizes = [1, 128], strides = [1, 1]} : vector<9x128xf32> to vector<1x128xf32>
    %187 = vector.broadcast %186 : vector<1x128xf32> to vector<16x128xf32>
    %188 = arith.mulf %187, %184 : vector<16x128xf32>
    %189 = vector.extract_strided_slice %183 {offsets = [1, 0], sizes = [1, 128], strides = [1, 1]} : vector<9x128xf32> to vector<1x128xf32>
    %190 = vector.broadcast %189 : vector<1x128xf32> to vector<16x128xf32>
    %191 = arith.mulf %190, %181 : vector<16x128xf32>
    %192 = arith.addf %188, %191 : vector<16x128xf32>
    %193 = vector.extract_strided_slice %183 {offsets = [2, 0], sizes = [1, 128], strides = [1, 1]} : vector<9x128xf32> to vector<1x128xf32>
    %194 = vector.broadcast %193 : vector<1x128xf32> to vector<16x128xf32>
    %195 = arith.mulf %194, %185 : vector<16x128xf32>
    %196 = arith.addf %192, %195 : vector<16x128xf32>
    %197 = vector.extract_strided_slice %183 {offsets = [3, 0], sizes = [1, 128], strides = [1, 1]} : vector<9x128xf32> to vector<1x128xf32>
    %198 = vector.broadcast %197 : vector<1x128xf32> to vector<16x128xf32>
    %199 = arith.mulf %198, %184 : vector<16x128xf32>
    %200 = vector.extract_strided_slice %183 {offsets = [4, 0], sizes = [1, 128], strides = [1, 1]} : vector<9x128xf32> to vector<1x128xf32>
    %201 = vector.broadcast %200 : vector<1x128xf32> to vector<16x128xf32>
    %202 = arith.mulf %201, %181 : vector<16x128xf32>
    %203 = arith.addf %199, %202 : vector<16x128xf32>
    %204 = vector.extract_strided_slice %183 {offsets = [5, 0], sizes = [1, 128], strides = [1, 1]} : vector<9x128xf32> to vector<1x128xf32>
    %205 = vector.broadcast %204 : vector<1x128xf32> to vector<16x128xf32>
    %206 = arith.mulf %205, %185 : vector<16x128xf32>
    %207 = arith.addf %203, %206 : vector<16x128xf32>
    %208 = vector.extract_strided_slice %183 {offsets = [6, 0], sizes = [1, 128], strides = [1, 1]} : vector<9x128xf32> to vector<1x128xf32>
    %209 = vector.broadcast %208 : vector<1x128xf32> to vector<16x128xf32>
    %210 = arith.mulf %209, %184 : vector<16x128xf32>
    %211 = vector.extract_strided_slice %183 {offsets = [7, 0], sizes = [1, 128], strides = [1, 1]} : vector<9x128xf32> to vector<1x128xf32>
    %212 = vector.broadcast %211 : vector<1x128xf32> to vector<16x128xf32>
    %213 = arith.mulf %212, %181 : vector<16x128xf32>
    %214 = arith.addf %210, %213 : vector<16x128xf32>
    %215 = vector.extract_strided_slice %183 {offsets = [8, 0], sizes = [1, 128], strides = [1, 1]} : vector<9x128xf32> to vector<1x128xf32>
    %216 = vector.broadcast %215 : vector<1x128xf32> to vector<16x128xf32>
    %217 = arith.mulf %216, %185 : vector<16x128xf32>
    %218 = arith.addf %214, %217 : vector<16x128xf32>
    %c1_i32_71 = arith.constant 1 : i32
    %219 = tpu.dynamic_rotate %196 by %c1_i32_71 dim 0 : vector<16x128xf32>, i32 -> vector<16x128xf32>
    %c0_72 = arith.constant 0 : index
    %c0_73 = arith.constant 0 : index
    %c0_74 = arith.constant 0 : index
    %220 = vector.load %arg10[%c0_72, %c0_73, %c0_74] : memref<2x16x1xf32, #tpu.memory_space<vmem>>, vector<1x16x1xf32>
    %221 = vector.shape_cast %220 : vector<1x16x1xf32> to vector<16x1xf32>
    %222 = vector.broadcast %221 : vector<16x1xf32> to vector<16x128xf32>
    %223 = arith.mulf %219, %222 : vector<16x128xf32>
    %224 = arith.addf %223, %207 : vector<16x128xf32>
    %c15_i32_75 = arith.constant 15 : i32
    %225 = tpu.dynamic_rotate %218 by %c15_i32_75 dim 0 : vector<16x128xf32>, i32 -> vector<16x128xf32>
    %c1_76 = arith.constant 1 : index
    %c0_77 = arith.constant 0 : index
    %c0_78 = arith.constant 0 : index
    %226 = vector.load %arg10[%c1_76, %c0_77, %c0_78] : memref<2x16x1xf32, #tpu.memory_space<vmem>>, vector<1x16x1xf32>
    %227 = vector.shape_cast %226 : vector<1x16x1xf32> to vector<16x1xf32>
    %228 = vector.broadcast %227 : vector<16x1xf32> to vector<16x128xf32>
    %229 = arith.mulf %225, %228 : vector<16x128xf32>
    %230 = arith.addf %224, %229 : vector<16x128xf32>
    %c1_79 = arith.constant 1 : index
    %c0_80 = arith.constant 0 : index
    %c0_81 = arith.constant 0 : index
    %231 = vector.load %arg5[%c1_79, %c0_80, %c0_81] : memref<4x1x128xf32, #tpu.memory_space<vmem>>, vector<1x1x128xf32>
    %232 = vector.shape_cast %231 : vector<1x1x128xf32> to vector<1x128xf32>
    %233 = vector.broadcast %232 : vector<1x128xf32> to vector<16x128xf32>
    %234 = arith.addf %230, %233 : vector<16x128xf32>
    %235 = arith.addf %234, %134 : vector<16x128xf32>
    %236 = math.absf %235 : vector<16x128xf32>
    %cst_82 = arith.constant 0.707106769 : f32
    %237 = vector.broadcast %cst_82 : f32 to vector<16x128xf32>
    %238 = arith.mulf %237, %236 : vector<16x128xf32>
    %cst_83 = arith.constant 0.327591091 : f32
    %239 = vector.broadcast %cst_83 : f32 to vector<16x128xf32>
    %240 = arith.mulf %239, %238 : vector<16x128xf32>
    %cst_84 = arith.constant 1.000000e+00 : f32
    %241 = vector.broadcast %cst_84 : f32 to vector<16x128xf32>
    %242 = arith.addf %241, %240 : vector<16x128xf32>
    %243 = tpu.reciprocal %242 {approx = true} : vector<16x128xf32> -> vector<16x128xf32>
    %cst_85 = arith.constant 1.06140542 : f32
    %244 = vector.broadcast %cst_85 : f32 to vector<16x128xf32>
    %245 = arith.mulf %244, %243 : vector<16x128xf32>
    %cst_86 = arith.constant 1.45315206 : f32
    %246 = vector.broadcast %cst_86 : f32 to vector<16x128xf32>
    %247 = arith.subf %245, %246 : vector<16x128xf32>
    %248 = arith.mulf %247, %243 : vector<16x128xf32>
    %cst_87 = arith.constant 1.42141378 : f32
    %249 = vector.broadcast %cst_87 : f32 to vector<16x128xf32>
    %250 = arith.addf %248, %249 : vector<16x128xf32>
    %251 = arith.mulf %250, %243 : vector<16x128xf32>
    %cst_88 = arith.constant 0.284496725 : f32
    %252 = vector.broadcast %cst_88 : f32 to vector<16x128xf32>
    %253 = arith.subf %251, %252 : vector<16x128xf32>
    %254 = arith.mulf %253, %243 : vector<16x128xf32>
    %cst_89 = arith.constant 0.254829586 : f32
    %255 = vector.broadcast %cst_89 : f32 to vector<16x128xf32>
    %256 = arith.addf %254, %255 : vector<16x128xf32>
    %257 = arith.mulf %256, %243 : vector<16x128xf32>
    %cst_90 = arith.constant 0.000000e+00 : f32
    %258 = vector.broadcast %cst_90 : f32 to vector<16x128xf32>
    %259 = arith.maximumf %235, %258 : vector<16x128xf32>
    %cst_91 = arith.constant 5.000000e-01 : f32
    %260 = vector.broadcast %cst_91 : f32 to vector<16x128xf32>
    %261 = arith.mulf %260, %236 : vector<16x128xf32>
    %262 = arith.mulf %261, %257 : vector<16x128xf32>
    %cst_92 = arith.constant -5.000000e-01 : f32
    %263 = vector.broadcast %cst_92 : f32 to vector<16x128xf32>
    %264 = arith.mulf %263, %235 : vector<16x128xf32>
    %265 = arith.mulf %264, %235 : vector<16x128xf32>
    %266 = math.exp %265 : vector<16x128xf32>
    %267 = arith.mulf %262, %266 : vector<16x128xf32>
    %268 = arith.subf %259, %267 : vector<16x128xf32>
    %269 = arith.addf %46, %180 : vector<16x128xf32>
    %c2 = arith.constant 2 : index
    %c0_93 = arith.constant 0 : index
    %c0_94 = arith.constant 0 : index
    %270 = vector.load %arg2[%c2, %c0_93, %c0_94] : memref<3x128x192xbf16, #tpu.memory_space<vmem>>, vector<1x128x192xbf16>
    %271 = vector.shape_cast %270 : vector<1x128x192xbf16> to vector<128x192xbf16>
    %272 = arith.truncf %268 : vector<16x128xf32> to vector<16x128xbf16>
    %cst_95 = arith.constant dense<0.000000e+00> : vector<16x192xf32>
    %273 = tpu.matmul %272, %271, %cst_95 {dimension_numbers = #tpu.dot_dimension_numbers<[1], [0], [0], [1], [0, 0, 1, 1], [], []>} : vector<16x128xbf16>, vector<128x192xbf16>, vector<16x192xf32> -> vector<16x192xf32>
    %274 = vector.extract_strided_slice %273 {offsets = [0, 128], sizes = [16, 64], strides = [1, 1]} : vector<16x192xf32> to vector<16x64xf32>
    %c2_96 = arith.constant 2 : index
    %c0_97 = arith.constant 0 : index
    %c0_98 = arith.constant 0 : index
    %275 = vector.load %arg3[%c2_96, %c0_97, %c0_98] : memref<3x1x64xf32, #tpu.memory_space<vmem>>, vector<1x1x64xf32>
    %276 = vector.shape_cast %275 : vector<1x1x64xf32> to vector<1x64xf32>
    %277 = vector.broadcast %276 : vector<1x64xf32> to vector<16x64xf32>
    %278 = arith.addf %274, %277 : vector<16x64xf32>
    %279 = math.absf %278 : vector<16x64xf32>
    %cst_99 = arith.constant 0.707106769 : f32
    %280 = vector.broadcast %cst_99 : f32 to vector<16x64xf32>
    %281 = arith.mulf %280, %279 : vector<16x64xf32>
    %cst_100 = arith.constant 0.327591091 : f32
    %282 = vector.broadcast %cst_100 : f32 to vector<16x64xf32>
    %283 = arith.mulf %282, %281 : vector<16x64xf32>
    %cst_101 = arith.constant 1.000000e+00 : f32
    %284 = vector.broadcast %cst_101 : f32 to vector<16x64xf32>
    %285 = arith.addf %284, %283 : vector<16x64xf32>
    %286 = tpu.reciprocal %285 {approx = true} : vector<16x64xf32> -> vector<16x64xf32>
    %cst_102 = arith.constant 1.06140542 : f32
    %287 = vector.broadcast %cst_102 : f32 to vector<16x64xf32>
    %288 = arith.mulf %287, %286 : vector<16x64xf32>
    %cst_103 = arith.constant 1.45315206 : f32
    %289 = vector.broadcast %cst_103 : f32 to vector<16x64xf32>
    %290 = arith.subf %288, %289 : vector<16x64xf32>
    %291 = arith.mulf %290, %286 : vector<16x64xf32>
    %cst_104 = arith.constant 1.42141378 : f32
    %292 = vector.broadcast %cst_104 : f32 to vector<16x64xf32>
    %293 = arith.addf %291, %292 : vector<16x64xf32>
    %294 = arith.mulf %293, %286 : vector<16x64xf32>
    %cst_105 = arith.constant 0.284496725 : f32
    %295 = vector.broadcast %cst_105 : f32 to vector<16x64xf32>
    %296 = arith.subf %294, %295 : vector<16x64xf32>
    %297 = arith.mulf %296, %286 : vector<16x64xf32>
    %cst_106 = arith.constant 0.254829586 : f32
    %298 = vector.broadcast %cst_106 : f32 to vector<16x64xf32>
    %299 = arith.addf %297, %298 : vector<16x64xf32>
    %300 = arith.mulf %299, %286 : vector<16x64xf32>
    %cst_107 = arith.constant 0.000000e+00 : f32
    %301 = vector.broadcast %cst_107 : f32 to vector<16x64xf32>
    %302 = arith.maximumf %278, %301 : vector<16x64xf32>
    %cst_108 = arith.constant 5.000000e-01 : f32
    %303 = vector.broadcast %cst_108 : f32 to vector<16x64xf32>
    %304 = arith.mulf %303, %279 : vector<16x64xf32>
    %305 = arith.mulf %304, %300 : vector<16x64xf32>
    %cst_109 = arith.constant -5.000000e-01 : f32
    %306 = vector.broadcast %cst_109 : f32 to vector<16x64xf32>
    %307 = arith.mulf %306, %278 : vector<16x64xf32>
    %308 = arith.mulf %307, %278 : vector<16x64xf32>
    %309 = math.exp %308 : vector<16x64xf32>
    %310 = arith.mulf %305, %309 : vector<16x64xf32>
    %311 = arith.subf %302, %310 : vector<16x64xf32>
    %312 = arith.truncf %311 : vector<16x64xf32> to vector<16x64xbf16>
    %c2_110 = arith.constant 2 : index
    %c0_111 = arith.constant 0 : index
    %c0_112 = arith.constant 0 : index
    %313 = vector.load %arg7[%c2_110, %c0_111, %c0_112] : memref<3x64x128xbf16, #tpu.memory_space<vmem>>, vector<1x64x128xbf16>
    %314 = vector.shape_cast %313 : vector<1x64x128xbf16> to vector<64x128xbf16>
    %cst_113 = arith.constant dense<0.000000e+00> : vector<16x128xf32>
    %315 = tpu.matmul %312, %314, %cst_113 {dimension_numbers = #tpu.dot_dimension_numbers<[1], [0], [0], [1], [0, 0, 1, 1], [], []>} : vector<16x64xbf16>, vector<64x128xbf16>, vector<16x128xf32> -> vector<16x128xf32>
    %316 = vector.extract_strided_slice %273 {offsets = [0, 0], sizes = [16, 128], strides = [1, 1]} : vector<16x192xf32> to vector<16x128xf32>
    %c2_114 = arith.constant 2 : index
    %c0_115 = arith.constant 0 : index
    %c0_116 = arith.constant 0 : index
    %317 = vector.load %arg4[%c2_114, %c0_115, %c0_116] : memref<4x9x128xf32, #tpu.memory_space<vmem>>, vector<1x9x128xf32>
    %318 = vector.shape_cast %317 : vector<1x9x128xf32> to vector<9x128xf32>
    %c8_i32_117 = arith.constant 8 : i32
    %319 = tpu.dynamic_rotate %316 by %c8_i32_117 dim 1 : vector<16x128xf32>, i32 -> vector<16x128xf32>
    %c120_i32_118 = arith.constant 120 : i32
    %320 = tpu.dynamic_rotate %316 by %c120_i32_118 dim 1 : vector<16x128xf32>, i32 -> vector<16x128xf32>
    %321 = vector.extract_strided_slice %318 {offsets = [0, 0], sizes = [1, 128], strides = [1, 1]} : vector<9x128xf32> to vector<1x128xf32>
    %322 = vector.broadcast %321 : vector<1x128xf32> to vector<16x128xf32>
    %323 = arith.mulf %322, %319 : vector<16x128xf32>
    %324 = vector.extract_strided_slice %318 {offsets = [1, 0], sizes = [1, 128], strides = [1, 1]} : vector<9x128xf32> to vector<1x128xf32>
    %325 = vector.broadcast %324 : vector<1x128xf32> to vector<16x128xf32>
    %326 = arith.mulf %325, %316 : vector<16x128xf32>
    %327 = arith.addf %323, %326 : vector<16x128xf32>
    %328 = vector.extract_strided_slice %318 {offsets = [2, 0], sizes = [1, 128], strides = [1, 1]} : vector<9x128xf32> to vector<1x128xf32>
    %329 = vector.broadcast %328 : vector<1x128xf32> to vector<16x128xf32>
    %330 = arith.mulf %329, %320 : vector<16x128xf32>
    %331 = arith.addf %327, %330 : vector<16x128xf32>
    %332 = vector.extract_strided_slice %318 {offsets = [3, 0], sizes = [1, 128], strides = [1, 1]} : vector<9x128xf32> to vector<1x128xf32>
    %333 = vector.broadcast %332 : vector<1x128xf32> to vector<16x128xf32>
    %334 = arith.mulf %333, %319 : vector<16x128xf32>
    %335 = vector.extract_strided_slice %318 {offsets = [4, 0], sizes = [1, 128], strides = [1, 1]} : vector<9x128xf32> to vector<1x128xf32>
    %336 = vector.broadcast %335 : vector<1x128xf32> to vector<16x128xf32>
    %337 = arith.mulf %336, %316 : vector<16x128xf32>
    %338 = arith.addf %334, %337 : vector<16x128xf32>
    %339 = vector.extract_strided_slice %318 {offsets = [5, 0], sizes = [1, 128], strides = [1, 1]} : vector<9x128xf32> to vector<1x128xf32>
    %340 = vector.broadcast %339 : vector<1x128xf32> to vector<16x128xf32>
    %341 = arith.mulf %340, %320 : vector<16x128xf32>
    %342 = arith.addf %338, %341 : vector<16x128xf32>
    %343 = vector.extract_strided_slice %318 {offsets = [6, 0], sizes = [1, 128], strides = [1, 1]} : vector<9x128xf32> to vector<1x128xf32>
    %344 = vector.broadcast %343 : vector<1x128xf32> to vector<16x128xf32>
    %345 = arith.mulf %344, %319 : vector<16x128xf32>
    %346 = vector.extract_strided_slice %318 {offsets = [7, 0], sizes = [1, 128], strides = [1, 1]} : vector<9x128xf32> to vector<1x128xf32>
    %347 = vector.broadcast %346 : vector<1x128xf32> to vector<16x128xf32>
    %348 = arith.mulf %347, %316 : vector<16x128xf32>
    %349 = arith.addf %345, %348 : vector<16x128xf32>
    %350 = vector.extract_strided_slice %318 {offsets = [8, 0], sizes = [1, 128], strides = [1, 1]} : vector<9x128xf32> to vector<1x128xf32>
    %351 = vector.broadcast %350 : vector<1x128xf32> to vector<16x128xf32>
    %352 = arith.mulf %351, %320 : vector<16x128xf32>
    %353 = arith.addf %349, %352 : vector<16x128xf32>
    %c1_i32_119 = arith.constant 1 : i32
    %354 = tpu.dynamic_rotate %331 by %c1_i32_119 dim 0 : vector<16x128xf32>, i32 -> vector<16x128xf32>
    %c0_120 = arith.constant 0 : index
    %c0_121 = arith.constant 0 : index
    %c0_122 = arith.constant 0 : index
    %355 = vector.load %arg10[%c0_120, %c0_121, %c0_122] : memref<2x16x1xf32, #tpu.memory_space<vmem>>, vector<1x16x1xf32>
    %356 = vector.shape_cast %355 : vector<1x16x1xf32> to vector<16x1xf32>
    %357 = vector.broadcast %356 : vector<16x1xf32> to vector<16x128xf32>
    %358 = arith.mulf %354, %357 : vector<16x128xf32>
    %359 = arith.addf %358, %342 : vector<16x128xf32>
    %c15_i32_123 = arith.constant 15 : i32
    %360 = tpu.dynamic_rotate %353 by %c15_i32_123 dim 0 : vector<16x128xf32>, i32 -> vector<16x128xf32>
    %c1_124 = arith.constant 1 : index
    %c0_125 = arith.constant 0 : index
    %c0_126 = arith.constant 0 : index
    %361 = vector.load %arg10[%c1_124, %c0_125, %c0_126] : memref<2x16x1xf32, #tpu.memory_space<vmem>>, vector<1x16x1xf32>
    %362 = vector.shape_cast %361 : vector<1x16x1xf32> to vector<16x1xf32>
    %363 = vector.broadcast %362 : vector<16x1xf32> to vector<16x128xf32>
    %364 = arith.mulf %360, %363 : vector<16x128xf32>
    %365 = arith.addf %359, %364 : vector<16x128xf32>
    %c2_127 = arith.constant 2 : index
    %c0_128 = arith.constant 0 : index
    %c0_129 = arith.constant 0 : index
    %366 = vector.load %arg5[%c2_127, %c0_128, %c0_129] : memref<4x1x128xf32, #tpu.memory_space<vmem>>, vector<1x1x128xf32>
    %367 = vector.shape_cast %366 : vector<1x1x128xf32> to vector<1x128xf32>
    %368 = vector.broadcast %367 : vector<1x128xf32> to vector<16x128xf32>
    %369 = arith.addf %365, %368 : vector<16x128xf32>
    %370 = arith.addf %369, %268 : vector<16x128xf32>
    %371 = math.absf %370 : vector<16x128xf32>
    %cst_130 = arith.constant 0.707106769 : f32
    %372 = vector.broadcast %cst_130 : f32 to vector<16x128xf32>
    %373 = arith.mulf %372, %371 : vector<16x128xf32>
    %cst_131 = arith.constant 0.327591091 : f32
    %374 = vector.broadcast %cst_131 : f32 to vector<16x128xf32>
    %375 = arith.mulf %374, %373 : vector<16x128xf32>
    %cst_132 = arith.constant 1.000000e+00 : f32
    %376 = vector.broadcast %cst_132 : f32 to vector<16x128xf32>
    %377 = arith.addf %376, %375 : vector<16x128xf32>
    %378 = tpu.reciprocal %377 {approx = true} : vector<16x128xf32> -> vector<16x128xf32>
    %cst_133 = arith.constant 1.06140542 : f32
    %379 = vector.broadcast %cst_133 : f32 to vector<16x128xf32>
    %380 = arith.mulf %379, %378 : vector<16x128xf32>
    %cst_134 = arith.constant 1.45315206 : f32
    %381 = vector.broadcast %cst_134 : f32 to vector<16x128xf32>
    %382 = arith.subf %380, %381 : vector<16x128xf32>
    %383 = arith.mulf %382, %378 : vector<16x128xf32>
    %cst_135 = arith.constant 1.42141378 : f32
    %384 = vector.broadcast %cst_135 : f32 to vector<16x128xf32>
    %385 = arith.addf %383, %384 : vector<16x128xf32>
    %386 = arith.mulf %385, %378 : vector<16x128xf32>
    %cst_136 = arith.constant 0.284496725 : f32
    %387 = vector.broadcast %cst_136 : f32 to vector<16x128xf32>
    %388 = arith.subf %386, %387 : vector<16x128xf32>
    %389 = arith.mulf %388, %378 : vector<16x128xf32>
    %cst_137 = arith.constant 0.254829586 : f32
    %390 = vector.broadcast %cst_137 : f32 to vector<16x128xf32>
    %391 = arith.addf %389, %390 : vector<16x128xf32>
    %392 = arith.mulf %391, %378 : vector<16x128xf32>
    %cst_138 = arith.constant 0.000000e+00 : f32
    %393 = vector.broadcast %cst_138 : f32 to vector<16x128xf32>
    %394 = arith.maximumf %370, %393 : vector<16x128xf32>
    %cst_139 = arith.constant 5.000000e-01 : f32
    %395 = vector.broadcast %cst_139 : f32 to vector<16x128xf32>
    %396 = arith.mulf %395, %371 : vector<16x128xf32>
    %397 = arith.mulf %396, %392 : vector<16x128xf32>
    %cst_140 = arith.constant -5.000000e-01 : f32
    %398 = vector.broadcast %cst_140 : f32 to vector<16x128xf32>
    %399 = arith.mulf %398, %370 : vector<16x128xf32>
    %400 = arith.mulf %399, %370 : vector<16x128xf32>
    %401 = math.exp %400 : vector<16x128xf32>
    %402 = arith.mulf %397, %401 : vector<16x128xf32>
    %403 = arith.subf %394, %402 : vector<16x128xf32>
    %404 = arith.addf %269, %315 : vector<16x128xf32>
    %c0_141 = arith.constant 0 : index
    %c0_142 = arith.constant 0 : index
    %405 = vector.load %arg6[%c0_141, %c0_142] : memref<128x128xbf16, #tpu.memory_space<vmem>>, vector<128x128xbf16>
    %406 = arith.truncf %403 : vector<16x128xf32> to vector<16x128xbf16>
    %cst_143 = arith.constant dense<0.000000e+00> : vector<16x128xf32>
    %407 = tpu.matmul %406, %405, %cst_143 {dimension_numbers = #tpu.dot_dimension_numbers<[1], [0], [0], [1], [0, 0, 1, 1], [], []>} : vector<16x128xbf16>, vector<128x128xbf16>, vector<16x128xf32> -> vector<16x128xf32>
    %c3 = arith.constant 3 : index
    %c0_144 = arith.constant 0 : index
    %c0_145 = arith.constant 0 : index
    %408 = vector.load %arg4[%c3, %c0_144, %c0_145] : memref<4x9x128xf32, #tpu.memory_space<vmem>>, vector<1x9x128xf32>
    %409 = vector.shape_cast %408 : vector<1x9x128xf32> to vector<9x128xf32>
    %c8_i32_146 = arith.constant 8 : i32
    %410 = tpu.dynamic_rotate %407 by %c8_i32_146 dim 1 : vector<16x128xf32>, i32 -> vector<16x128xf32>
    %c120_i32_147 = arith.constant 120 : i32
    %411 = tpu.dynamic_rotate %407 by %c120_i32_147 dim 1 : vector<16x128xf32>, i32 -> vector<16x128xf32>
    %412 = vector.extract_strided_slice %409 {offsets = [0, 0], sizes = [1, 128], strides = [1, 1]} : vector<9x128xf32> to vector<1x128xf32>
    %413 = vector.broadcast %412 : vector<1x128xf32> to vector<16x128xf32>
    %414 = arith.mulf %413, %410 : vector<16x128xf32>
    %415 = vector.extract_strided_slice %409 {offsets = [1, 0], sizes = [1, 128], strides = [1, 1]} : vector<9x128xf32> to vector<1x128xf32>
    %416 = vector.broadcast %415 : vector<1x128xf32> to vector<16x128xf32>
    %417 = arith.mulf %416, %407 : vector<16x128xf32>
    %418 = arith.addf %414, %417 : vector<16x128xf32>
    %419 = vector.extract_strided_slice %409 {offsets = [2, 0], sizes = [1, 128], strides = [1, 1]} : vector<9x128xf32> to vector<1x128xf32>
    %420 = vector.broadcast %419 : vector<1x128xf32> to vector<16x128xf32>
    %421 = arith.mulf %420, %411 : vector<16x128xf32>
    %422 = arith.addf %418, %421 : vector<16x128xf32>
    %423 = vector.extract_strided_slice %409 {offsets = [3, 0], sizes = [1, 128], strides = [1, 1]} : vector<9x128xf32> to vector<1x128xf32>
    %424 = vector.broadcast %423 : vector<1x128xf32> to vector<16x128xf32>
    %425 = arith.mulf %424, %410 : vector<16x128xf32>
    %426 = vector.extract_strided_slice %409 {offsets = [4, 0], sizes = [1, 128], strides = [1, 1]} : vector<9x128xf32> to vector<1x128xf32>
    %427 = vector.broadcast %426 : vector<1x128xf32> to vector<16x128xf32>
    %428 = arith.mulf %427, %407 : vector<16x128xf32>
    %429 = arith.addf %425, %428 : vector<16x128xf32>
    %430 = vector.extract_strided_slice %409 {offsets = [5, 0], sizes = [1, 128], strides = [1, 1]} : vector<9x128xf32> to vector<1x128xf32>
    %431 = vector.broadcast %430 : vector<1x128xf32> to vector<16x128xf32>
    %432 = arith.mulf %431, %411 : vector<16x128xf32>
    %433 = arith.addf %429, %432 : vector<16x128xf32>
    %434 = vector.extract_strided_slice %409 {offsets = [6, 0], sizes = [1, 128], strides = [1, 1]} : vector<9x128xf32> to vector<1x128xf32>
    %435 = vector.broadcast %434 : vector<1x128xf32> to vector<16x128xf32>
    %436 = arith.mulf %435, %410 : vector<16x128xf32>
    %437 = vector.extract_strided_slice %409 {offsets = [7, 0], sizes = [1, 128], strides = [1, 1]} : vector<9x128xf32> to vector<1x128xf32>
    %438 = vector.broadcast %437 : vector<1x128xf32> to vector<16x128xf32>
    %439 = arith.mulf %438, %407 : vector<16x128xf32>
    %440 = arith.addf %436, %439 : vector<16x128xf32>
    %441 = vector.extract_strided_slice %409 {offsets = [8, 0], sizes = [1, 128], strides = [1, 1]} : vector<9x128xf32> to vector<1x128xf32>
    %442 = vector.broadcast %441 : vector<1x128xf32> to vector<16x128xf32>
    %443 = arith.mulf %442, %411 : vector<16x128xf32>
    %444 = arith.addf %440, %443 : vector<16x128xf32>
    %c1_i32_148 = arith.constant 1 : i32
    %445 = tpu.dynamic_rotate %422 by %c1_i32_148 dim 0 : vector<16x128xf32>, i32 -> vector<16x128xf32>
    %c0_149 = arith.constant 0 : index
    %c0_150 = arith.constant 0 : index
    %c0_151 = arith.constant 0 : index
    %446 = vector.load %arg10[%c0_149, %c0_150, %c0_151] : memref<2x16x1xf32, #tpu.memory_space<vmem>>, vector<1x16x1xf32>
    %447 = vector.shape_cast %446 : vector<1x16x1xf32> to vector<16x1xf32>
    %448 = vector.broadcast %447 : vector<16x1xf32> to vector<16x128xf32>
    %449 = arith.mulf %445, %448 : vector<16x128xf32>
    %450 = arith.addf %449, %433 : vector<16x128xf32>
    %c15_i32_152 = arith.constant 15 : i32
    %451 = tpu.dynamic_rotate %444 by %c15_i32_152 dim 0 : vector<16x128xf32>, i32 -> vector<16x128xf32>
    %c1_153 = arith.constant 1 : index
    %c0_154 = arith.constant 0 : index
    %c0_155 = arith.constant 0 : index
    %452 = vector.load %arg10[%c1_153, %c0_154, %c0_155] : memref<2x16x1xf32, #tpu.memory_space<vmem>>, vector<1x16x1xf32>
    %453 = vector.shape_cast %452 : vector<1x16x1xf32> to vector<16x1xf32>
    %454 = vector.broadcast %453 : vector<16x1xf32> to vector<16x128xf32>
    %455 = arith.mulf %451, %454 : vector<16x128xf32>
    %456 = arith.addf %450, %455 : vector<16x128xf32>
    %c3_156 = arith.constant 3 : index
    %c0_157 = arith.constant 0 : index
    %c0_158 = arith.constant 0 : index
    %457 = vector.load %arg5[%c3_156, %c0_157, %c0_158] : memref<4x1x128xf32, #tpu.memory_space<vmem>>, vector<1x1x128xf32>
    %458 = vector.shape_cast %457 : vector<1x1x128xf32> to vector<1x128xf32>
    %459 = vector.broadcast %458 : vector<1x128xf32> to vector<16x128xf32>
    %460 = arith.addf %456, %459 : vector<16x128xf32>
    %461 = math.absf %460 : vector<16x128xf32>
    %cst_159 = arith.constant 0.707106769 : f32
    %462 = vector.broadcast %cst_159 : f32 to vector<16x128xf32>
    %463 = arith.mulf %462, %461 : vector<16x128xf32>
    %cst_160 = arith.constant 0.327591091 : f32
    %464 = vector.broadcast %cst_160 : f32 to vector<16x128xf32>
    %465 = arith.mulf %464, %463 : vector<16x128xf32>
    %cst_161 = arith.constant 1.000000e+00 : f32
    %466 = vector.broadcast %cst_161 : f32 to vector<16x128xf32>
    %467 = arith.addf %466, %465 : vector<16x128xf32>
    %468 = tpu.reciprocal %467 {approx = true} : vector<16x128xf32> -> vector<16x128xf32>
    %cst_162 = arith.constant 1.06140542 : f32
    %469 = vector.broadcast %cst_162 : f32 to vector<16x128xf32>
    %470 = arith.mulf %469, %468 : vector<16x128xf32>
    %cst_163 = arith.constant 1.45315206 : f32
    %471 = vector.broadcast %cst_163 : f32 to vector<16x128xf32>
    %472 = arith.subf %470, %471 : vector<16x128xf32>
    %473 = arith.mulf %472, %468 : vector<16x128xf32>
    %cst_164 = arith.constant 1.42141378 : f32
    %474 = vector.broadcast %cst_164 : f32 to vector<16x128xf32>
    %475 = arith.addf %473, %474 : vector<16x128xf32>
    %476 = arith.mulf %475, %468 : vector<16x128xf32>
    %cst_165 = arith.constant 0.284496725 : f32
    %477 = vector.broadcast %cst_165 : f32 to vector<16x128xf32>
    %478 = arith.subf %476, %477 : vector<16x128xf32>
    %479 = arith.mulf %478, %468 : vector<16x128xf32>
    %cst_166 = arith.constant 0.254829586 : f32
    %480 = vector.broadcast %cst_166 : f32 to vector<16x128xf32>
    %481 = arith.addf %479, %480 : vector<16x128xf32>
    %482 = arith.mulf %481, %468 : vector<16x128xf32>
    %cst_167 = arith.constant 0.000000e+00 : f32
    %483 = vector.broadcast %cst_167 : f32 to vector<16x128xf32>
    %484 = arith.maximumf %460, %483 : vector<16x128xf32>
    %cst_168 = arith.constant 5.000000e-01 : f32
    %485 = vector.broadcast %cst_168 : f32 to vector<16x128xf32>
    %486 = arith.mulf %485, %461 : vector<16x128xf32>
    %487 = arith.mulf %486, %482 : vector<16x128xf32>
    %cst_169 = arith.constant -5.000000e-01 : f32
    %488 = vector.broadcast %cst_169 : f32 to vector<16x128xf32>
    %489 = arith.mulf %488, %460 : vector<16x128xf32>
    %490 = arith.mulf %489, %460 : vector<16x128xf32>
    %491 = math.exp %490 : vector<16x128xf32>
    %492 = arith.mulf %487, %491 : vector<16x128xf32>
    %493 = arith.subf %484, %492 : vector<16x128xf32>
    %494 = arith.truncf %493 : vector<16x128xf32> to vector<16x128xbf16>
    %c0_170 = arith.constant 0 : index
    %c0_171 = arith.constant 0 : index
    %495 = vector.load %arg8[%c0_170, %c0_171] : memref<128x128xbf16, #tpu.memory_space<vmem>>, vector<128x128xbf16>
    %cst_172 = arith.constant dense<0.000000e+00> : vector<16x128xf32>
    %496 = tpu.matmul %494, %495, %cst_172 {dimension_numbers = #tpu.dot_dimension_numbers<[1], [0], [0], [1], [0, 0, 1, 1], [], []>} : vector<16x128xbf16>, vector<128x128xbf16>, vector<16x128xf32> -> vector<16x128xf32>
    %497 = arith.addf %404, %496 : vector<16x128xf32>
    %c0_173 = arith.constant 0 : index
    %c0_174 = arith.constant 0 : index
    %498 = vector.load %arg9[%c0_173, %c0_174] : memref<1x128xf32, #tpu.memory_space<vmem>>, vector<1x128xf32>
    %499 = vector.broadcast %498 : vector<1x128xf32> to vector<16x128xf32>
    %500 = arith.addf %497, %499 : vector<16x128xf32>
    %c0_175 = arith.constant 0 : index
    %c0_176 = arith.constant 0 : index
    %501 = vector.load %arg11[%c0_175, %c0_176] : memref<16x128xf32, #tpu.memory_space<vmem>>, vector<16x128xf32>
    tpu.vector_store %arg11[%c0_175, %c0_176], %500 {strides = array<i32>} : memref<16x128xf32, #tpu.memory_space<vmem>>, vector<16x128xf32>,
    return
  }
  func.func @transform_0(%arg0: i32) -> (i32, i32) {
    %c0_i32 = arith.constant 0 : i32
    %c0_i32_0 = arith.constant 0 : i32
    return %arg0, %c0_i32 : i32, i32
  }
  func.func @transform_1(%arg0: i32) -> (i32, i32, i32) {
    %c0_i32 = arith.constant 0 : i32
    %c0_i32_0 = arith.constant 0 : i32
    %c0_i32_1 = arith.constant 0 : i32
    %c0_i32_2 = arith.constant 0 : i32
    return %c0_i32, %c0_i32_0, %c0_i32_1 : i32, i32, i32
  }
  func.func @transform_2(%arg0: i32) -> (i32, i32, i32) {
    %c0_i32 = arith.constant 0 : i32
    %c0_i32_0 = arith.constant 0 : i32
    %c0_i32_1 = arith.constant 0 : i32
    %c0_i32_2 = arith.constant 0 : i32
    return %c0_i32, %c0_i32_0, %c0_i32_1 : i32, i32, i32
  }
  func.func @transform_3(%arg0: i32) -> (i32, i32, i32) {
    %c0_i32 = arith.constant 0 : i32
    %c0_i32_0 = arith.constant 0 : i32
    %c0_i32_1 = arith.constant 0 : i32
    %c0_i32_2 = arith.constant 0 : i32
    return %c0_i32, %c0_i32_0, %c0_i32_1 : i32, i32, i32
  }
  func.func @transform_4(%arg0: i32) -> (i32, i32, i32) {
    %c0_i32 = arith.constant 0 : i32
    %c0_i32_0 = arith.constant 0 : i32
    %c0_i32_1 = arith.constant 0 : i32
    %c0_i32_2 = arith.constant 0 : i32
    return %c0_i32, %c0_i32_0, %c0_i32_1 : i32, i32, i32
  }
  func.func @transform_5(%arg0: i32) -> (i32, i32) {
    %c0_i32 = arith.constant 0 : i32
    %c0_i32_0 = arith.constant 0 : i32
    %c0_i32_1 = arith.constant 0 : i32
    return %c0_i32, %c0_i32_0 : i32, i32
  }
  func.func @transform_6(%arg0: i32) -> (i32, i32, i32) {
    %c0_i32 = arith.constant 0 : i32
    %c0_i32_0 = arith.constant 0 : i32
    %c0_i32_1 = arith.constant 0 : i32
    %c0_i32_2 = arith.constant 0 : i32
    return %c0_i32, %c0_i32_0, %c0_i32_1 : i32, i32, i32
  }
  func.func @transform_7(%arg0: i32) -> (i32, i32) {
    %c0_i32 = arith.constant 0 : i32
    %c0_i32_0 = arith.constant 0 : i32
    %c0_i32_1 = arith.constant 0 : i32
    return %c0_i32, %c0_i32_0 : i32, i32
  }
  func.func @transform_8(%arg0: i32) -> (i32, i32) {
    %c0_i32 = arith.constant 0 : i32
    %c0_i32_0 = arith.constant 0 : i32
    %c0_i32_1 = arith.constant 0 : i32
    return %c0_i32, %c0_i32_0 : i32, i32
  }
  func.func @transform_9(%arg0: i32) -> (i32, i32, i32) {
    %c0_i32 = arith.constant 0 : i32
    %c0_i32_0 = arith.constant 0 : i32
    %c0_i32_1 = arith.constant 0 : i32
    %c0_i32_2 = arith.constant 0 : i32
    return %c0_i32, %c0_i32_0, %c0_i32_1 : i32, i32, i32
  }
  func.func @transform_10(%arg0: i32) -> (i32, i32) {
    %c0_i32 = arith.constant 0 : i32
    %c0_i32_0 = arith.constant 0 : i32
    return %arg0, %c0_i32 : i32, i32
  }
}

</mosaic_0001>

<bundles_post_ra>
// kernel: tpu_custom_call.1
= control target key start
LH: loop header
LB: loop body
LE: loop exit
PB: predicated region body
PF: predicated region fallthrough
CT: control target
= control target key end

     0   :  { %15 = vsyncpa [#allocation3], 0  ;;  %s3439_s0 = inlined_call_operand.vmem [shape: f32[32,128], index: 0, kind: input, shape index: {}]   ;;  %s3440_s1 = inlined_call_operand.vmem [shape: bf16[3,128,192], index: 1, kind: input, shape index: {}]   ;;  %s3441_s2 = inlined_call_operand.vmem [shape: f32[3,1,64], index: 2, kind: input, shape index: {}]   ;;  %s3442_s3 = inlined_call_operand.vmem [shape: f32[4,9,128], index: 3, kind: input, shape index: {}]   ;;  %s3443_s4 = inlined_call_operand.vmem [shape: f32[4,1,128], index: 4, kind: input, shape index: {}]   ;;  %s3444_s5 = inlined_call_operand.vmem [shape: bf16[128,128], index: 5, kind: input, shape index: {}]   ;;  %s3445_s6 = inlined_call_operand.vmem [shape: bf16[3,64,128], index: 6, kind: input, shape index: {}]   ;;  %s3446_s7 = inlined_call_operand.vmem [shape: bf16[128,128], index: 7, kind: input, shape index: {}]   ;;  %s3447_s8 = inlined_call_operand.vmem [shape: f32[1,128], index: 8, kind: input, shape index: {}]   ;;  %s3448_s9 = inlined_call_operand.vmem [shape: f32[2,16,1], index: 9, kind: input, shape index: {}]   ;;  %s3449_s10 = inlined_call_operand.hbm [shape: f32[32,128], index: 10, kind: output, shape index: {}]  }
   0x1   :  { %17 = vsyncpa [#allocation3 + $0x1], 0  ;;  %s2750_s13 = smov 0   ;;  %s2752_s14 = smov 0  }
   0x2   :  { %s2754_s15 = smov 0   ;;  %s2756_s16 = smov 0  }
   0x3 LB: > { %s2771_s17 = sadd.s32 4294967295, %s2686_s16   ;;  %s2119_s18 = sadd.s32 4294967294, %s2686_s16   ;;  %s2686_s16 = sphi %s2756_s16, %s3457_s16   ;;  %s2682_s15 = sphi %s2754_s15, %s3456_s15   ;;  %s2678_s14 = sphi %s2752_s14, %s3455_s14   ;;  %s2674_s13 = sphi %s2750_s13, %s3454_s13  }
   0x4   : > { %s2775_s19 = sadd.s32 1, %s2686_s16   ;;  %s245_s20 = sadd.s32 1, %s2682_s15 }
   0x5   : > { %s242_s21 = ssub.s32 %s2686_s16, %s2775_s19  ;;  %p255_p0 = scmp.ne.s32.totalorder %s2682_s15, %s2678_s14 }
   0x6   : > { %p243_p1 = scmp.eq.s32.totalorder %s242_s21, 0  ;;  %p256_p2 = scmp.eq.s32.totalorder %s2771_s17, 1 }
   0x7   : > { %p261_p3 = scmp.ne.s32.totalorder %s2678_s14, %s2674_s13  ;;  %p262_p4 = scmp.eq.s32.totalorder %s2119_s18, 1 }
   0x8   : > { %s2786_s22 = scalar_select %p243_p1, %s2682_s15, %s245_s20  }
   0x9   : > { %p2788_p5 = por %p256_p2, %p255_p0  ;;  %p2792_p6 = por %p262_p4, %p261_p3 }
   0xa   : > { %3450 = sst [smem:[#allocation5_spill]] %s2786_s22  ;;  %p2122_p7 = scmp.ge.s32.totalorder %s2686_s16, 1 }
   0xb   : > { %p316_p8 = scmp.lt.s32.totalorder %s2686_s16, 3 }
   0xd   : > { %p317_p9 = pnand %p2122_p7, %p316_p8 }
   0xe   : > { %v2468_v0 = vld [vmem:[%s3440_s1 + $0x4] ss:$8 sps:$4 sm:$0xff] (!%p317_p9)   ;;  %v2470_v1 = vld [vmem:[%s3440_s1] ss:$8 sps:$4 sm:$0xff] (!%p317_p9)   ;;  %v2688_v2 = vmov (!%p317_p9), 0   ;;  %s2124_s21 = sshll.u32 (!%p317_p9), %s2771_s17, 1 }
   0xf   : > { %320 = sbr.rel (%p317_p9) target bundleno = 1869 (0x74d), region = 60  ;;  %493 = vmatprep.mubr.bf16.mxu0 (!%p317_p9), %v2688_v2  ;;  %2467 = vset.pattern.permute.xlu1 (!%p317_p9), %v2688_v2  ;;  %v2471_v3 = vld [vmem:[%s3440_s1 + $0x14] ss:$8 sps:$4 sm:$0xff] (!%p317_p9)   ;;  %v2473_v4 = vld [vmem:[%s3440_s1 + $0x10] ss:$8 sps:$4 sm:$0xff] (!%p317_p9)   ;;  %p355_p10 = scmp.lt.s32.totalorder (!%p317_p9), %s2124_s21, 3 }
  0x10   : > { %461 = vmatprep.subr.bf16.mxu0 (!%p317_p9), %v2468_v0  ;;  %2466 = vset.pattern.permute.xlu0 (!%p317_p9), %v2688_v2  ;;  %v2474_v5 = vld [vmem:[%s3440_s1 + $0x24] ss:$8 sps:$4 sm:$0xff] (!%p317_p9)   ;;  %v2476_v6 = vld [vmem:[%s3440_s1 + $0x20] ss:$8 sps:$4 sm:$0xff] (!%p317_p9)   ;;  %v2477_v7 = vld [vmem:[%s3440_s1 + $0x34] ss:$8 sps:$4 sm:$0xff] (!%p317_p9)  }
  0x11   : > { %462 = vmatpush1.bf16.msra.mxu0 (!%p317_p9), %v2470_v1  ;;  %876 = vmatprep.mubr.bf16.mxu1 (!%p317_p9), %v2688_v2  ;;  %v2479_v8 = vld [vmem:[%s3440_s1 + $0x30] ss:$8 sps:$4 sm:$0xff] (!%p317_p9)   ;;  %v2480_v9 = vld [vmem:[%s3440_s1 + $0x44] ss:$8 sps:$4 sm:$0xff] (!%p317_p9)   ;;  %v2482_v12 = vld [vmem:[%s3440_s1 + $0x40] ss:$8 sps:$4 sm:$0xff] (!%p317_p9)  }
  0x12   : > { %463 = vmatprep.subr.bf16.mxu0 (!%p317_p9), %v2471_v3  ;;  %v652_v10 = vld [vmem:[%s3448_s9 + $0x8] sm:$0xff] (!%p317_p9)  ;;  %v651_v11 = vld [vmem:[%s3448_s9] sm:$0xff] (!%p317_p9)  ;;  %v2483_v13 = vld [vmem:[%s3440_s1 + $0x54] ss:$8 sps:$4 sm:$0xff] (!%p317_p9)   ;;  %s2690_s25 = smov (!%p317_p9), 8   ;;  %v2691_v52 = vmov (!%p317_p9), 0.0  }
  0x13   : > { %660 = vperm.xlu1 (!%p317_p9), %2467, %v652_v10   ;;  %655 = vperm.xlu0 (!%p317_p9), %2466, %v651_v11   ;;  %v2485_v14 = vld [vmem:[%s3440_s1 + $0x50] ss:$8 sps:$4 sm:$0xff] (!%p317_p9)   ;;  %v2486_v15 = vld [vmem:[%s3440_s1 + $0x64] ss:$8 sps:$4 sm:$0xff] (!%p317_p9)   ;;  %v2488_v16 = vld [vmem:[%s3440_s1 + $0x60] ss:$8 sps:$4 sm:$0xff] (!%p317_p9)  }
  0x14   : > { %v2489_v17 = vld [vmem:[%s3440_s1 + $0x74] ss:$8 sps:$4 sm:$0xff] (!%p317_p9)   ;;  %v2491_v18 = vld [vmem:[%s3440_s1 + $0x70] ss:$8 sps:$4 sm:$0xff] (!%p317_p9)   ;;  %v2142_v22 = vld [vmem:[%s3441_s2] ss:$0 sm:$0xff] (!%p317_p9) }
  0x15   : > { %464 = vmatpush1.bf16.msra.mxu0 (!%p317_p9), %v2473_v4  ;;  %v2148_v32 = vld [vmem:[%s3448_s9 + $0x10] sm:$0xff] (!%p317_p9)  ;;  %v2149_v33 = vld [vmem:[%s3448_s9 + $0x18] sm:$0xff] (!%p317_p9)  ;;  %v2492_v39 = vld [vmem:[%s3440_s1 + $0x84] ss:$8 sps:$4 sm:$0xff] (!%p317_p9)   ;;  %vm2692_vm0 = vmmov (!%p317_p9), 0   ;;  %vm977_vm3 = vcmask (!%p317_p9), 523264  }
  0x16   : > { %465 = vmatprep.subr.bf16.mxu0 %v2474_v5  ;;  %s3459_s21 = smov (!%p355_p10, %s2124_s21), 3  ;;  %v2494_v40 = vld [vmem:[%s3440_s1 + $0x80] ss:$8 sps:$4 sm:$0xff]   ;;  %v2495_v41 = vld [vmem:[%s3440_s1 + $0x94] ss:$8 sps:$4 sm:$0xff]   ;;  %844 = vmatprep.subr.bf16.mxu1 %v2492_v39  ;;  %s351_s26 = sand.u32 1, %s2678_s14  }
  0x17   : > { %s2125_s18 = sshll.u32 %s3459_s21, 3  ;;  %845 = vmatpush1.bf16.msra.mxu1 %v2494_v40  ;;  %v2497_v45 = vld [vmem:[%s3440_s1 + $0x90] ss:$8 sps:$4 sm:$0xff]   ;;  %v2498_v47 = vld [vmem:[%s3440_s1 + $0xa4] ss:$8 sps:$4 sm:$0xff]   ;;  %s2123_s27 = sshll.u32 %s351_s26, 4 }
  0x18   : > { %s358_s11 = scalar_lea.vmem %s3439_s0, %s2125_s18  ;;  %s2689_s18 = smov 120   ;;  %846 = vmatprep.subr.bf16.mxu1 %v2495_v41  ;;  %v2500_v54 = vld [vmem:[%s3440_s1 + $0xa0] ss:$8 sps:$4 sm:$0xff]   ;;  %v2501_v57 = vld [vmem:[%s3440_s1 + $0xb4] ss:$8 sps:$4 sm:$0xff]  }
  0x19   : > { %466 = vmatpush1.bf16.msra.mxu0 %v2476_v6  ;;  %v2860_v19 = vld [vmem:[%s358_s11] sm:$0xff]  ;;  %v2862_v20 = vld [vmem:[%s358_s11 + $0x8] sm:$0xff]  ;;  %v2503_v62 = vld [vmem:[%s3440_s1 + $0xb0] ss:$8 sps:$4 sm:$0xff]   ;;  %s353_s30 = scalar_lea.vmem [#allocation2], %s2123_s27  ;;  %s3397_s22 = scalar_lea.sflag [#allocation3], %s351_s26 }
  0x1a   : > { %467 = vmatprep.subr.bf16.mxu0 %v2477_v7  ;;  %v380_v21 = vpack.c.bf16 %v2862_v20, %v2860_v19  ;;  %v2504_v1 = vld [vmem:[%s3440_s1 + $0xc4] ss:$8 sps:$4 sm:$0xff]   ;;  %v2506_v5 = vld [vmem:[%s3440_s1 + $0xc0] ss:$8 sps:$4 sm:$0xff]   ;;  %v2509_v11 = vld [vmem:[%s3440_s1 + $0xd0] ss:$8 sps:$4 sm:$0xff]  }
  0x1b   : > { %847 = vmatpush1.bf16.msra.mxu1 %v2497_v45  ;;  %s2057_s11 = sshll.u32 %s353_s30, 4  ;;  %s2693_s27 = smov [#allocation2]   ;;  %s3390_s11 = int_to_ptr.vmem [resolvable:$true] %s2057_s11 }
  0x1c   : > { %848 = vmatprep.subr.bf16.mxu1 %v2498_v47  ;;  %s2628_s28 = sshll.u32 %s2693_s27, 4  ;;  %s2629_s28 = int_to_ptr.vmem [resolvable:$false] %s2628_s28 }
  0x1d   : > { %468 = vmatpush1.bf16.msra.mxu0 %v2479_v8  ;;  %v2507_v8 = vld [vmem:[%s3440_s1 + $0xd4] ss:$8 sps:$4 sm:$0xff]   ;;  %s2630_s29 = scalar_lea.vmem %s2629_s28, 512  ;;  %p2631_p0 = scmp.lt.s32.totalorder %s3390_s11, %s2629_s28 }
  0x1e   : > { %469 = vmatprep.subr.bf16.mxu0 %v2480_v9 }
  0x1f   : > { %849 = vmatpush1.bf16.msra.mxu1 %v2500_v54 }
  0x20   : > { %850 = vmatprep.subr.bf16.mxu1 %v2501_v57 }
  0x21   : > { %470 = vmatpush1.bf16.msra.mxu0 %v2482_v12 }
  0x22   : > { %471 = vmatprep.subr.bf16.mxu0 %v2483_v13 }
  0x23   : > { %851 = vmatpush1.bf16.msra.mxu1 %v2503_v62 }
  0x24   : > { %852 = vmatprep.subr.bf16.mxu1 %v2504_v1 }
  0x25   : > { %472 = vmatpush1.bf16.msra.mxu0 %v2485_v14 }
  0x26   : > { %473 = vmatprep.subr.bf16.mxu0 %v2486_v15  ;;  %v2510_v15 = vld [vmem:[%s3440_s1 + $0xe4] ss:$8 sps:$4 sm:$0xff]  }
  0x27   : > { %853 = vmatpush1.bf16.msra.mxu1 %v2506_v5 }
  0x28   : > { %854 = vmatprep.subr.bf16.mxu1 %v2507_v8 }
  0x29   : > { %474 = vmatpush1.bf16.msra.mxu0 %v2488_v16 }
  0x2a   : > { %475 = vmatprep.subr.bf16.mxu0 %v2489_v17 }
  0x2b   : > { %855 = vmatpush1.bf16.msra.mxu1 %v2509_v11 }
  0x2c   : > { %856 = vmatprep.subr.bf16.mxu1 %v2510_v15 }
  0x2d   : > { %476 = vmatpush1.bf16.msra.mxu0 %v2491_v18 }
  0x2e   : > { %2345 = vmatprep.subr.bf16.mxu0 %v2691_v52 }
  0x30   : > { %494 = vmatmul.mubr.bf16.vlgmr.msra.gmra.mrb[0].mxu0 %v380_v21 }
  0x31   : > { %2353 = vmatprep.mubr.msk.bf16.mxu0 %vm2692_vm0, %v2691_v52 }
  0x92   : > { %v2970_v39 = vpop.permute.xlu1 %660  ;;  %v2972_v40 = vpop.permute.xlu0 %655 }
 0x103   : > { %v2869_v23 = vpop.f32.mrb[0].mxu0 }
 0x104   : > { %574 = vrot.lane.b32.xlu1 %v2869_v23, %s2689_s18  ;;  %570 = vrot.lane.b32.xlu0 %v2869_v23, %s2690_s25  ;;  %v497_v24 = vpop.f32.mrb[1].mxu0 }
 0x105   : > { %v2875_v25 = vadd.f32 %v2142_v22, %v497_v24  ;;  %v2877_v26 = vpop.f32.mrb[2].mxu0 }
 0x106   : > { %v501_v27 = vpop.f32.mrb[3].mxu0 }
 0x107   : > { %v513_v28 = vand.u32 2147483647, %v2875_v25  ;;  %v2880_v29 = vadd.f32 %v2142_v22, %v501_v27  ;;  %v547_v42 = vmul.f32 -0.5, %v2875_v25  ;;  %v2512_v22 = vld [vmem:[%s3440_s1 + $0xe0] ss:$8 sps:$4 sm:$0xff]  }
 0x108   : > { %576 = vrot.lane.b32.xlu1 %v2877_v26, %s2689_s18  ;;  %572 = vrot.lane.b32.xlu0 %v2877_v26, %s2690_s25 }
 0x109   : > { %v515_v30 = vmul.f32 0.70710677, %v513_v28  ;;  %v514_v31 = vand.u32 2147483647, %v2880_v29  ;;  %v548_v44 = vmul.f32 -0.5, %v2880_v29  ;;  %v549_v49 = vmul.f32 %v547_v42, %v2875_v25  ;;  %857 = vmatpush1.bf16.msra.mxu1 %v2512_v22 }
 0x10a   : > { %v543_v13 = vmul.f32 0.5, %v513_v28  ;;  %v2513_v28 = vld [vmem:[%s3440_s1 + $0xf4] ss:$8 sps:$4 sm:$0xff]  }
 0x10b   : > { %v517_v34 = vmul.f32 0.3275911, %v515_v30  ;;  %v516_v35 = vmul.f32 0.70710677, %v514_v31  ;;  %v550_v53 = vmul.f32 %v548_v44, %v2880_v29  ;;  %v551_v58 = vmul.f32 1.442695, %v549_v49  ;;  %858 = vmatprep.subr.bf16.mxu1 %v2513_v28 }
 0x10c   : > { %677 = vperm.xlu1 %2467, %v2148_v32   ;;  %682 = vperm.xlu0 %2466, %v2149_v33   ;;  %v544_v18 = vmul.f32 0.5, %v514_v31  ;;  %v541_v32 = vmax.f32 %v2875_v25, 0.0  ;;  %v542_v33 = vmax.f32 %v2880_v29, 0.0  ;;  %v2515_v31 = vld [vmem:[%s3440_s1 + $0xf0] ss:$8 sps:$4 sm:$0xff]   ;;  %v578_v25 = vlaneseq }
 0x10d   : > { %v519_v36 = vadd.f32 1.0, %v517_v34  ;;  %v518_v37 = vmul.f32 0.3275911, %v516_v35  ;;  %v553_v61 = vmul.f32 1.442695, %v550_v53  ;;  %859 = vmatpush1.bf16.msra.mxu1 %v2515_v31 }
 0x10e   : > { %2357 = vmatprep.subr.bf16.mxu1 %v2691_v52  ;;  %v2965_v29 = vshrl.u32 %v578_v25, 7 }
 0x10f   : > { %2568 = vrcp.f32 %v519_v36  ;;  %v520_v38 = vadd.f32 1.0, %v518_v37 }
 0x110   : > { %v2975_v41 = vsub.s32 1, %v2965_v29  ;;  %v2978_v42 = vsub.s32 6, %v2965_v29  ;;  %v2984_v44 = vsub.s32 7, %v2965_v29  ;;  %vm648_vm1 = vcmp.lt.s32.totalorder %v2965_v29, 1 }
 0x111   : > { %2570 = vrcp.f32 %v520_v38  ;;  %v2968_v38 = vsub.s32 0, %v2965_v29  ;;  %vm669_vm2 = vcmp.lt.s32.totalorder %v2965_v29, 7 }
 0x112   : > { %2572 = vpow2.f32 %v551_v58 }
 0x113   : > { %2574 = vpow2.f32 %v553_v61 }
 0x119   : > { %v2569_v43 = vpop.eup %2568 }
 0x11a   : > { %v523_v46 = vmul.f32 1.0614054, %v2569_v43 }
 0x11b   : > { %v2571_v48 = vpop.eup %2570 }
 0x11c   : > { %v2143_v50 = vadd.f32 -1.4531521, %v523_v46  ;;  %v524_v51 = vmul.f32 1.0614054, %v2571_v48  ;;  %v2573_v21 = vpop.eup %2572  ;;  %v2988_v46 = vsub.s32 2, %v2965_v29 }
 0x11d   : > { %v2575_v30 = vpop.eup %2574 }
 0x11e   : > { %v527_v55 = vmul.f32 %v2569_v43, %v2143_v50  ;;  %v2144_v56 = vadd.f32 -1.4531521, %v524_v51  ;;  %v2996_v50 = vsub.s32 4, %v2965_v29 }
 0x120   : > { %v529_v59 = vadd.f32 1.4214138, %v527_v55  ;;  %v528_v60 = vmul.f32 %v2571_v48, %v2144_v56  ;;  %v3000_v55 = vsub.s32 5, %v2965_v29 }
 0x122   : > { %v531_v63 = vmul.f32 %v2569_v43, %v529_v59  ;;  %v530_v0 = vadd.f32 1.4214138, %v528_v60 }
 0x124   : > { %v2145_v3 = vadd.f32 -0.28449672, %v531_v63  ;;  %v532_v4 = vmul.f32 %v2571_v48, %v530_v0  ;;  %v2147_v63 = vld [vmem:[%s3442_s3 + $0x8] ss:$0 sm:$0xff] }
 0x126   : > { %v535_v6 = vmul.f32 %v2569_v43, %v2145_v3  ;;  %v2146_v7 = vadd.f32 -0.28449672, %v532_v4 }
 0x128   : > { %v537_v9 = vadd.f32 0.2548296, %v535_v6  ;;  %v536_v10 = vmul.f32 %v2571_v48, %v2146_v7 }
 0x12a   : > { %v539_v12 = vmul.f32 %v2569_v43, %v537_v9  ;;  %v538_v14 = vadd.f32 0.2548296, %v536_v10  ;;  %v568_v43 = vld [vmem:[%s3442_s3] sm:$0xff] }
 0x12b   : > { %v581_v45 = vrot.slane %v568_v43, %v2968_v38  ;;  %v587_v47 = vrot.slane %v568_v43, %v2975_v41  ;;  %v625_v49 = vrot.slane %v568_v43, %v2978_v42  ;;  %v631_v51 = vrot.slane %v568_v43, %v2984_v44 }
 0x12c   : > { %v545_v16 = vmul.f32 %v543_v13, %v539_v12  ;;  %v540_v17 = vmul.f32 %v2571_v48, %v538_v14  ;;  %v2992_v48 = vsub.s32 3, %v2965_v29  ;;  %v595_v57 = vrot.slane %v568_v43, %v2988_v46 }
 0x12d   : > { %v588_v59 = vmul.f32 %v587_v47, %v2869_v23  ;;  %v609_v61 = vrot.slane %v568_v43, %v2996_v50  ;;  %v632_v62 = vmul.f32 %v631_v51, %v2869_v23  ;;  %v617_v3 = vrot.slane %v568_v43, %v3000_v55 }
 0x12e   : > { %v555_v24 = vmul.f32 %v2573_v21, %v545_v16  ;;  %v546_v27 = vmul.f32 %v544_v18, %v540_v17  ;;  %v603_v58 = vrot.slane %v568_v43, %v2992_v48  ;;  %v589_v6 = vmul.f32 %v587_v47, %v2877_v26 }
 0x12f   : > { %v610_v12 = vmul.f32 %v609_v61, %v2869_v23  ;;  %v633_v14 = vmul.f32 %v631_v51, %v2877_v26  ;;  %v611_v18 = vmul.f32 %v609_v61, %v2877_v26 }
 0x130   : > { %v556_v34 = vmul.f32 %v2575_v30, %v546_v27  ;;  %v2956_v35 = vsub.f32 %v541_v32, %v555_v24 }
 0x132   : > { %v2958_v36 = vsub.f32 %v542_v33, %v556_v34 }
 0x134   : > { %v559_v37 = vpack.c.bf16 %v2958_v36, %v2956_v35  ;;  %v2522_v35 = vld [vmem:[%s3445_s6 + $0x30] sm:$0xff]   ;;  %v2523_v36 = vld [vmem:[%s3445_s6 + $0x38] sm:$0xff]  }
 0x176   : > { %v575_v53 = vpop.permute.xlu1 %574  ;;  %v571_v54 = vpop.permute.xlu0 %570 }
 0x177   : > { %v582_v56 = vmul.f32 %v581_v45, %v571_v54  ;;  %v626_v60 = vmul.f32 %v625_v49, %v571_v54  ;;  %v596_v7 = vmul.f32 %v595_v57, %v575_v53  ;;  %v604_v8 = vmul.f32 %v603_v58, %v571_v54 }
 0x178   : > { %v640_v11 = vmul.f32 %v2147_v63, %v575_v53  ;;  %v618_v23 = vmul.f32 %v617_v3, %v575_v53 }
 0x179   : > { %v590_v0 = vadd.f32 %v588_v59, %v582_v56  ;;  %v634_v4 = vadd.f32 %v632_v62, %v626_v60  ;;  %v612_v27 = vadd.f32 %v610_v12, %v604_v8 }
 0x17a   : > { %v573_v1 = vpop.permute.xlu0 %572  ;;  %v577_v5 = vpop.permute.xlu1 %576 }
 0x17b   : > { %v583_v9 = vmul.f32 %v581_v45, %v573_v1  ;;  %v605_v10 = vmul.f32 %v603_v58, %v573_v1  ;;  %v627_v13 = vmul.f32 %v625_v49, %v573_v1  ;;  %v598_v15 = vadd.f32 %v596_v7, %v590_v0 }
 0x17c   : > { %v597_v16 = vmul.f32 %v595_v57, %v577_v5  ;;  %v642_v21 = vadd.f32 %v640_v11, %v634_v4  ;;  %v641_v22 = vmul.f32 %v2147_v63, %v577_v5  ;;  %v619_v34 = vmul.f32 %v617_v3, %v577_v5  ;;  %v2150_v63 = vld [vmem:[%s3443_s4] ss:$0 sm:$0xff] }
 0x17d   : > { %v591_v17 = vadd.f32 %v589_v6, %v583_v9  ;;  %v635_v24 = vadd.f32 %v633_v14, %v627_v13  ;;  %v613_v30 = vadd.f32 %v611_v18, %v605_v10  ;;  %v644_v33 = vrot.slane %v598_v15, 7 }
 0x17e   : > { %v667_v25 = vrot.slane %v642_v21, 1  ;;  %v620_v45 = vadd.f32 %v618_v23, %v612_v27 }
 0x17f   : > { %v599_v28 = vadd.f32 %v597_v16, %v591_v17  ;;  %v643_v32 = vadd.f32 %v641_v22, %v635_v24  ;;  %v621_v47 = vadd.f32 %v619_v34, %v613_v30 }
 0x181   : > { %v645_v31 = vrot.slane %v599_v28, 7  ;;  %v668_v43 = vrot.slane %v643_v32, 1 }
 0x183   : > { %v649_v26 = vsel %vm648_vm1, %v644_v33, %v645_v31  ;;  %v650_v49 = vsel %vm648_vm1, %v645_v31, %v644_v33  ;;  %v670_v53 = vsel %vm669_vm2, %v667_v25, %v668_v43  ;;  %v671_v56 = vsel %vm669_vm2, %v668_v43, %v667_v25 }
 0x184   : > { %v664_v51 = vmul.f32 %v2970_v39, %v649_v26  ;;  %v663_v54 = vmul.f32 %v2972_v40, %v650_v49 }
 0x186   : > { %v666_v57 = vadd.f32 %v664_v51, %v621_v47  ;;  %v665_v58 = vadd.f32 %v663_v54, %v620_v45 }
 0x18b   : > { %v3027_v59 = vpop.permute.xlu1 %677  ;;  %v3029_v60 = vpop.permute.xlu0 %682 }
 0x18c   : > { %v685_v61 = vmul.f32 %v3027_v59, %v670_v53  ;;  %v686_v62 = vmul.f32 %v3029_v60, %v671_v56 }
 0x18e   : > { %v687_v0 = vadd.f32 %v685_v61, %v665_v58  ;;  %v688_v1 = vadd.f32 %v686_v62, %v666_v57 }
 0x190   : > { %v696_v3 = vadd.f32 %v2150_v63, %v687_v0  ;;  %v697_v4 = vadd.f32 %v2150_v63, %v688_v1 }
 0x192   : > { %v698_v5 = vadd.f32 %v696_v3, %v2860_v19  ;;  %v699_v6 = vadd.f32 %v697_v4, %v2862_v20 }
 0x194   : > { %v700_v7 = vand.u32 2147483647, %v698_v5  ;;  %v701_v8 = vand.u32 2147483647, %v699_v6  ;;  %v734_v15 = vmul.f32 -0.5, %v698_v5  ;;  %v735_v16 = vmul.f32 -0.5, %v699_v6 }
 0x195   : > { %v728_v0 = vmax.f32 %v698_v5, 0.0  ;;  %v729_v3 = vmax.f32 %v699_v6, 0.0 }
 0x196   : > { %v702_v9 = vmul.f32 0.70710677, %v700_v7  ;;  %v703_v10 = vmul.f32 0.70710677, %v701_v8  ;;  %v736_v22 = vmul.f32 %v734_v15, %v698_v5  ;;  %v737_v19 = vmul.f32 %v735_v16, %v699_v6  ;;  %v2517_v5 = vld [vmem:[%s3445_s6 + $0x8] sm:$0xff]   ;;  %v2518_v6 = vld [vmem:[%s3445_s6 + $0x10] sm:$0xff]  }
 0x197   : > { %v730_v53 = vmul.f32 0.5, %v700_v7  ;;  %v731_v57 = vmul.f32 0.5, %v701_v8  ;;  %v2519_v8 = vld [vmem:[%s3445_s6 + $0x18] sm:$0xff]  }
 0x198   : > { %v704_v11 = vmul.f32 0.3275911, %v702_v9  ;;  %v705_v12 = vmul.f32 0.3275911, %v703_v10  ;;  %v738_v32 = vmul.f32 1.442695, %v736_v22 }
 0x199   : > { %v740_v33 = vmul.f32 1.442695, %v737_v19 }
 0x19a   : > { %v706_v13 = vadd.f32 1.0, %v704_v11  ;;  %v707_v14 = vadd.f32 1.0, %v705_v12  ;;  %v2516_v11 = vld [vmem:[%s3445_s6] sm:$0xff]  }
 0x19b   : > { %v2520_v12 = vld [vmem:[%s3445_s6 + $0x20] sm:$0xff]  }
 0x19c   : > { %2576 = vrcp.f32 %v706_v13  ;;  %2346 = vmatpush3.bf16.msra.mxu0 %v2520_v12  ;;  %v2521_v13 = vld [vmem:[%s3445_s6 + $0x28] sm:$0xff]  }
 0x19d   : > { %2578 = vrcp.f32 %v707_v14  ;;  %2347 = vmatprep.subr.bf16.mxu0 %v2691_v52 }
 0x19e   : > { %2580 = vpow2.f32 %v738_v32 }
 0x19f   : > { %2582 = vpow2.f32 %v740_v33 }
 0x1a0   : > { %2348 = vmatpush3.bf16.msra.mxu0 %v2521_v13 }
 0x1a1   : > { %2349 = vmatprep.subr.bf16.mxu0 %v2691_v52 }
 0x1a4   : > { %2350 = vmatpush3.bf16.msra.mxu0 %v2522_v35 }
 0x1a5   : > { %2351 = vmatprep.subr.bf16.mxu0 %v2691_v52 }
 0x1a6   : > { %v2577_v17 = vpop.eup %2576 }
 0x1a7   : > { %v2579_v18 = vpop.eup %2578  ;;  %v710_v21 = vmul.f32 1.0614054, %v2577_v17 }
 0x1a8   : > { %v711_v24 = vmul.f32 1.0614054, %v2579_v18  ;;  %v2581_v61 = vpop.eup %2580  ;;  %2352 = vmatpush3.bf16.msra.mxu0 %v2523_v36 }
 0x1a9   : > { %v2151_v27 = vadd.f32 -1.4531521, %v710_v21  ;;  %v2583_v63 = vpop.eup %2582 }
 0x1aa   : > { %v2152_v20 = vadd.f32 -1.4531521, %v711_v24 }
 0x1ab   : > { %v714_v28 = vmul.f32 %v2577_v17, %v2151_v27 }
 0x1ac   : > { %v715_v30 = vmul.f32 %v2579_v18, %v2152_v20 }
 0x1ad   : > { %v716_v23 = vadd.f32 1.4214138, %v714_v28 }
 0x1ae   : > { %v717_v34 = vadd.f32 1.4214138, %v715_v30 }
 0x1af   : > { %v718_v31 = vmul.f32 %v2577_v17, %v716_v23  ;;  %v2526_v23 = vld [vmem:[%s3440_s1 + $0x104] ss:$8 sps:$4 sm:$0xff]  }
 0x1b0   : > { %v719_v25 = vmul.f32 %v2579_v18, %v717_v34  ;;  %1339 = vmatprep.subr.bf16.mxu0 %v2526_v23 }
 0x1b1   : > { %v2153_v43 = vadd.f32 -0.28449672, %v718_v31 }
 0x1b2   : > { %v2154_v45 = vadd.f32 -0.28449672, %v719_v25 }
 0x1b3   : > { %v722_v47 = vmul.f32 %v2577_v17, %v2153_v43 }
 0x1b4   : > { %v723_v26 = vmul.f32 %v2579_v18, %v2154_v45 }
 0x1b5   : > { %v724_v49 = vadd.f32 0.2548296, %v722_v47 }
 0x1b6   : > { %v725_v51 = vadd.f32 0.2548296, %v723_v26 }
 0x1b7   : > { %v726_v54 = vmul.f32 %v2577_v17, %v724_v49 }
 0x1b8   : > { %v727_v56 = vmul.f32 %v2579_v18, %v725_v51 }
 0x1b9   : > { %v732_v58 = vmul.f32 %v730_v53, %v726_v54 }
 0x1ba   : > { %v733_v62 = vmul.f32 %v731_v57, %v727_v56 }
 0x1bb   : > { %v742_v1 = vmul.f32 %v2581_v61, %v732_v58 }
 0x1bc   : > { %v743_v4 = vmul.f32 %v2583_v63, %v733_v62 }
 0x1bd   : > { %v3038_v9 = vsub.f32 %v728_v0, %v742_v1 }
 0x1be   : > { %v3040_v10 = vsub.f32 %v729_v3, %v743_v4 }
 0x1c0   : > { %v763_v7 = vpack.c.bf16 %v3040_v10, %v3038_v9 }
 0x1c2   : > { %877 = vmatmul.mubr.bf16.vlgmr.msra.gmra.mrb[0].mxu1 %v763_v7 }
 0x1c3   : > { %2358 = vmatpush3.bf16.msra.mxu1 %v2516_v11  ;;  %2365 = vmatprep.mubr.msk.bf16.mxu1 %vm2692_vm0, %v2691_v52 }
 0x1c4   : > { %2359 = vmatprep.subr.bf16.mxu1 %v2691_v52 }
 0x1c7   : > { %2360 = vmatpush3.bf16.msra.mxu1 %v2517_v5 }
 0x1c8   : > { %2361 = vmatprep.subr.bf16.mxu1 %v2691_v52 }
 0x1cb   : > { %2362 = vmatpush3.bf16.msra.mxu1 %v2518_v6 }
 0x1cc   : > { %2363 = vmatprep.subr.bf16.mxu1 %v2691_v52 }
 0x1cf   : > { %2364 = vmatpush3.bf16.msra.mxu1 %v2519_v8 }
 0x1d0   : > { %2369 = vmatprep.subr.bf16.mxu1 %v2691_v52 }
 0x1d2   : > { %2366 = vmatmul.mubr.msk.bf16.vlgmr.msra.gmra.mrb[4].mxu1 %vm977_vm3, %v559_v37  ;;  %v2188_v37 = vld [vmem:[%s3441_s2 + $0x1] ss:$0 sm:$0xff] }
 0x1d3   : > { %2377 = vmatprep.mubr.msk.bf16.mxu1 %vm2692_vm0, %v2691_v52 }
 0x295   : > { %v3086_v14 = vpop.f32.mrb[0].mxu1 }
 0x296   : > { %1025 = vrot.lane.b32.xlu1 %v3086_v14, %s2690_s25  ;;  %v880_v15 = vpop.f32.mrb[1].mxu1 }
 0x297   : > { %v895_v16 = vadd.f32 %v2188_v37, %v880_v15  ;;  %v3090_v17 = vpop.f32.mrb[2].mxu1 }
 0x298   : > { %1027 = vrot.lane.b32.xlu0 %v3090_v17, %s2690_s25  ;;  %v884_v18 = vpop.f32.mrb[3].mxu1 }
 0x299   : > { %v897_v21 = vand.u32 2147483647, %v895_v16  ;;  %v896_v22 = vadd.f32 %v2188_v37, %v884_v18  ;;  %v931_v43 = vmul.f32 -0.5, %v895_v16 }
 0x29a   : > { %1029 = vrot.lane.b32.xlu1 %v3086_v14, %s2689_s18 }
 0x29b   : > { %v899_v24 = vmul.f32 0.70710677, %v897_v21  ;;  %v898_v19 = vand.u32 2147483647, %v896_v22  ;;  %v932_v47 = vmul.f32 -0.5, %v896_v22  ;;  %v933_v51 = vmul.f32 %v931_v43, %v895_v16 }
 0x29c   : > { %1031 = vrot.lane.b32.xlu0 %v3090_v17, %s2689_s18  ;;  %v927_v13 = vmul.f32 0.5, %v897_v21  ;;  %v2529_v21 = vld [vmem:[%s3440_s1 + $0x114] ss:$8 sps:$4 sm:$0xff]  }
 0x29d   : > { %v901_v27 = vmul.f32 0.3275911, %v899_v24  ;;  %v900_v20 = vmul.f32 0.70710677, %v898_v19  ;;  %v934_v56 = vmul.f32 %v932_v47, %v896_v22  ;;  %v935_v61 = vmul.f32 1.442695, %v933_v51 }
 0x29e   : > { %v928_v15 = vmul.f32 0.5, %v898_v19  ;;  %v2530_v19 = vld [vmem:[%s3440_s1 + $0x120] ss:$8 sps:$4 sm:$0xff]   ;;  %v2538_v47 = vld [vmem:[%s3440_s1 + $0x144] ss:$8 sps:$4 sm:$0xff]  }
 0x29f   : > { %v903_v28 = vadd.f32 1.0, %v901_v27  ;;  %v902_v30 = vmul.f32 0.3275911, %v900_v20  ;;  %v937_v0 = vmul.f32 1.442695, %v934_v56 }
 0x2a0   : > { %v2539_v51 = vld [vmem:[%s3440_s1 + $0x150] ss:$8 sps:$4 sm:$0xff]   ;;  %v2547_v56 = vld [vmem:[%s3440_s1 + $0x174] ss:$8 sps:$4 sm:$0xff]  }
 0x2a1   : > { %2584 = vrcp.f32 %v903_v28  ;;  %v904_v32 = vadd.f32 1.0, %v902_v30  ;;  %v925_v28 = vmax.f32 %v895_v16, 0.0  ;;  %v926_v30 = vmax.f32 %v896_v22, 0.0  ;;  %v2527_v16 = vld [vmem:[%s3440_s1 + $0x110] ss:$8 sps:$4 sm:$0xff]  }
 0x2a2   : > { %v2532_v22 = vld [vmem:[%s3440_s1 + $0x124] ss:$8 sps:$4 sm:$0xff]  }
 0x2a3   : > { %2586 = vrcp.f32 %v904_v32 }
 0x2a4   : > { %2588 = vpow2.f32 %v935_v61 }
 0x2a5   : > { %v3101_v33 = vpop.f32.mrb[4].mxu1  ;;  %2590 = vpow2.f32 %v937_v0 }
 0x2a6   : > { %v2367_v34 = vpop.f32.mrb[5].mxu1 }
 0x2a7   : > { %v3103_v31 = vpop.f32.mrb[6].mxu1 }
 0x2a8   : > { %v2368_v25 = vpop.f32.mrb[7].mxu1 }
 0x2a9   : > { %v2524_v25 = vld [vmem:[%s3440_s1 + $0x100] ss:$8 sps:$4 sm:$0xff]  }
 0x2ab   : > { %v2585_v45 = vpop.eup %2584 }
 0x2ac   : > { %v907_v26 = vmul.f32 1.0614054, %v2585_v45 }
 0x2ad   : > { %v2587_v49 = vpop.eup %2586 }
 0x2ae   : > { %v2189_v54 = vadd.f32 -1.4531521, %v907_v26  ;;  %v908_v53 = vmul.f32 1.0614054, %v2587_v49  ;;  %v2589_v18 = vpop.eup %2588  ;;  %v2536_v26 = vld [vmem:[%s3440_s1 + $0x140] ss:$8 sps:$4 sm:$0xff]  }
 0x2af   : > { %v2591_v20 = vpop.eup %2590 }
 0x2b0   : > { %v911_v57 = vmul.f32 %v2585_v45, %v2189_v54  ;;  %v2190_v58 = vadd.f32 -1.4531521, %v908_v53  ;;  %v2544_v54 = vld [vmem:[%s3440_s1 + $0x164] ss:$8 sps:$4 sm:$0xff]   ;;  %v2542_v53 = vld [vmem:[%s3440_s1 + $0x160] ss:$8 sps:$4 sm:$0xff]  }
 0x2b2   : > { %v913_v62 = vadd.f32 1.4214138, %v911_v57  ;;  %v912_v63 = vmul.f32 %v2587_v49, %v2190_v58  ;;  %v2545_v57 = vld [vmem:[%s3440_s1 + $0x170] ss:$8 sps:$4 sm:$0xff]  }
 0x2b3   : > { %v2206_v58 = vld [vmem:[%s3442_s3 + $0x10] sm:$0xff] }
 0x2b4   : > { %v915_v1 = vmul.f32 %v2585_v45, %v913_v62  ;;  %v914_v3 = vadd.f32 1.4214138, %v912_v63  ;;  %v1036_v61 = vrot.slane %v2206_v58, %v2968_v38  ;;  %v1080_v62 = vrot.slane %v2206_v58, %v2978_v42 }
 0x2b5   : > { %v1042_v63 = vrot.slane %v2206_v58, %v2975_v41  ;;  %v1086_v0 = vrot.slane %v2206_v58, %v2984_v44 }
 0x2b6   : > { %v2191_v4 = vadd.f32 -0.28449672, %v915_v1  ;;  %v916_v11 = vmul.f32 %v2587_v49, %v914_v3 }
 0x2b8   : > { %v919_v7 = vmul.f32 %v2585_v45, %v2191_v4  ;;  %v2192_v5 = vadd.f32 -0.28449672, %v916_v11  ;;  %v1050_v4 = vrot.slane %v2206_v58, %v2988_v46  ;;  %v1058_v11 = vrot.slane %v2206_v58, %v2992_v48 }
 0x2ba   : > { %v921_v6 = vadd.f32 0.2548296, %v919_v7  ;;  %v920_v8 = vmul.f32 %v2587_v49, %v2192_v5 }
 0x2bc   : > { %v923_v12 = vmul.f32 %v2585_v45, %v921_v6  ;;  %v922_v35 = vadd.f32 0.2548296, %v920_v8  ;;  %v2535_v45 = vld [vmem:[%s3440_s1 + $0x134] ss:$8 sps:$4 sm:$0xff]   ;;  %v2208_v6 = vld [vmem:[%s3442_s3 + $0x18] ss:$0 sm:$0xff]  ;;  %v1043_v8 = vmul.f32 %v1042_v63, %v3086_v14 }
 0x2be   : > { %v929_v36 = vmul.f32 %v927_v13, %v923_v12  ;;  %v924_v37 = vmul.f32 %v2587_v49, %v922_v35  ;;  %v2541_v49 = vld [vmem:[%s3440_s1 + $0x154] ss:$8 sps:$4 sm:$0xff]   ;;  %v1064_v13 = vrot.slane %v2206_v58, %v2996_v50  ;;  %v1087_v35 = vmul.f32 %v1086_v0, %v3086_v14 }
 0x2c0   : > { %v939_v24 = vmul.f32 %v2589_v18, %v929_v36  ;;  %v930_v27 = vmul.f32 %v928_v15, %v924_v37  ;;  %v1072_v37 = vrot.slane %v2206_v58, %v3000_v55 }
 0x2c2   : > { %v940_v32 = vmul.f32 %v2591_v20, %v930_v27  ;;  %v941_v23 = vsub.f32 %v925_v28, %v939_v24  ;;  %v1044_v24 = vmul.f32 %v1042_v63, %v3090_v17 }
 0x2c4   : > { %v942_v34 = vsub.f32 %v926_v30, %v940_v32  ;;  %v1088_v32 = vmul.f32 %v1086_v0, %v3090_v17 }
 0x2c6   : > { %v943_v43 = vpack.c.bf16 %v942_v34, %v941_v23 }
 0x2c8   : > { %2354 = vmatmul.mubr.msk.bf16.vlgmr.msra.gmra.mrb[4].mxu0 %vm977_vm3, %v943_v43 }
 0x2c9   : > { %1340 = vmatpush1.bf16.msra.mxu0 %v2524_v25  ;;  %1371 = vmatprep.mubr.bf16.mxu0 %v2688_v2  ;;  %v2533_v2 = vld [vmem:[%s3440_s1 + $0x130] ss:$8 sps:$4 sm:$0xff]  }
 0x2ca   : > { %1341 = vmatprep.subr.bf16.mxu0 %v2529_v21 }
 0x2cd   : > { %1342 = vmatpush1.bf16.msra.mxu0 %v2527_v16  ;;  %v1065_v16 = vmul.f32 %v1064_v13, %v3086_v14 }
 0x2ce   : > { %1343 = vmatprep.subr.bf16.mxu0 %v2532_v22 }
 0x2d1   : > { %1344 = vmatpush1.bf16.msra.mxu0 %v2530_v19 }
 0x2d2   : > { %1345 = vmatprep.subr.bf16.mxu0 %v2535_v45 }
 0x2d5   : > { %1346 = vmatpush1.bf16.msra.mxu0 %v2533_v2  ;;  %v1066_v2 = vmul.f32 %v1064_v13, %v3090_v17 }
 0x2d6   : > { %1347 = vmatprep.subr.bf16.mxu0 %v2538_v47 }
 0x2d9   : > { %1348 = vmatpush1.bf16.msra.mxu0 %v2536_v26 }
 0x2da   : > { %1349 = vmatprep.subr.bf16.mxu0 %v2541_v49 }
 0x2dd   : > { %1350 = vmatpush1.bf16.msra.mxu0 %v2539_v51 }
 0x2de   : > { %1351 = vmatprep.subr.bf16.mxu0 %v2544_v54 }
 0x2e1   : > { %1352 = vmatpush1.bf16.msra.mxu0 %v2542_v53 }
 0x2e2   : > { %1353 = vmatprep.subr.bf16.mxu0 %v2547_v56 }
 0x2e5   : > { %1354 = vmatpush1.bf16.msra.mxu0 %v2545_v57 }
 0x2e6   : > { %2401 = vmatprep.subr.bf16.mxu0 %v2691_v52 }
 0x308   : > { %v1026_v1 = vpop.permute.xlu1 %1025 }
 0x309   : > { %v1037_v3 = vmul.f32 %v1036_v61, %v1026_v1  ;;  %v1081_v7 = vmul.f32 %v1080_v62, %v1026_v1  ;;  %v1059_v28 = vmul.f32 %v1058_v11, %v1026_v1 }
 0x30a   : > { %v1028_v5 = vpop.permute.xlu0 %1027 }
 0x30b   : > { %v1038_v12 = vmul.f32 %v1036_v61, %v1028_v5  ;;  %v1082_v36 = vmul.f32 %v1080_v62, %v1028_v5  ;;  %v1045_v18 = vadd.f32 %v1043_v8, %v1037_v3  ;;  %v1089_v30 = vadd.f32 %v1087_v35, %v1081_v7  ;;  %v2210_v8 = vld [vmem:[%s3443_s4 + $0x1] ss:$0 sm:$0xff] }
 0x30c   : > { %v1030_v15 = vpop.permute.xlu1 %1029  ;;  %v1060_v25 = vmul.f32 %v1058_v11, %v1028_v5  ;;  %v1067_v54 = vadd.f32 %v1065_v16, %v1059_v28 }
 0x30d   : > { %v1051_v27 = vmul.f32 %v1050_v4, %v1030_v15  ;;  %v1095_v20 = vmul.f32 %v2208_v6, %v1030_v15  ;;  %v1046_v34 = vadd.f32 %v1044_v24, %v1038_v12  ;;  %v1090_v22 = vadd.f32 %v1088_v32, %v1082_v36 }
 0x30e   : > { %v1032_v23 = vpop.permute.xlu0 %1031  ;;  %v1073_v47 = vmul.f32 %v1072_v37, %v1030_v15  ;;  %v1068_v53 = vadd.f32 %v1066_v2, %v1060_v25 }
 0x30f   : > { %v1053_v43 = vadd.f32 %v1051_v27, %v1045_v18  ;;  %v1052_v21 = vmul.f32 %v1050_v4, %v1032_v23  ;;  %v1097_v19 = vadd.f32 %v1095_v20, %v1089_v30  ;;  %v1096_v45 = vmul.f32 %v2208_v6, %v1032_v23 }
 0x310   : > { %v1074_v49 = vmul.f32 %v1072_v37, %v1032_v23  ;;  %v1075_v62 = vadd.f32 %v1073_v47, %v1067_v54 }
 0x311   : > { %v1054_v26 = vadd.f32 %v1052_v21, %v1046_v34  ;;  %v1098_v51 = vadd.f32 %v1096_v45, %v1090_v22  ;;  %v1099_v56 = vrot.slane %v1053_v43, 7  ;;  %v1107_v58 = vrot.slane %v1097_v19, 1 }
 0x312   : > { %v1076_v63 = vadd.f32 %v1074_v49, %v1068_v53 }
 0x313   : > { %v1100_v57 = vrot.slane %v1054_v26, 7  ;;  %v1108_v61 = vrot.slane %v1098_v51, 1 }
 0x315   : > { %v1101_v14 = vsel %vm648_vm1, %v1099_v56, %v1100_v57  ;;  %v1102_v0 = vsel %vm648_vm1, %v1100_v57, %v1099_v56  ;;  %v1109_v3 = vsel %vm669_vm2, %v1107_v58, %v1108_v61  ;;  %v1110_v4 = vsel %vm669_vm2, %v1108_v61, %v1107_v58 }
 0x316   : > { %v1103_v17 = vmul.f32 %v1102_v0, %v2972_v40  ;;  %v1104_v1 = vmul.f32 %v1101_v14, %v2970_v39  ;;  %v1111_v5 = vmul.f32 %v1109_v3, %v3027_v59  ;;  %v1112_v6 = vmul.f32 %v1110_v4, %v3029_v60 }
 0x318   : > { %v1105_v11 = vadd.f32 %v1103_v17, %v1075_v62  ;;  %v1106_v7 = vadd.f32 %v1104_v1, %v1076_v63 }
 0x31a   : > { %v1113_v12 = vadd.f32 %v1111_v5, %v1105_v11  ;;  %v1114_v13 = vadd.f32 %v1112_v6, %v1106_v7 }
 0x31c   : > { %v1123_v35 = vadd.f32 %v2210_v8, %v1113_v12  ;;  %v1124_v36 = vadd.f32 %v2210_v8, %v1114_v13 }
 0x31e   : > { %v1125_v37 = vadd.f32 %v1123_v35, %v3038_v9  ;;  %v1126_v15 = vadd.f32 %v1124_v36, %v3040_v10 }
 0x320   : > { %v1127_v18 = vand.u32 2147483647, %v1125_v37  ;;  %v1128_v24 = vand.u32 2147483647, %v1126_v15  ;;  %v1161_v34 = vmul.f32 -0.5, %v1125_v37  ;;  %v1162_v25 = vmul.f32 -0.5, %v1126_v15 }
 0x321   : > { %v1155_v6 = vmax.f32 %v1125_v37, 0.0  ;;  %v1156_v12 = vmax.f32 %v1126_v15, 0.0 }
 0x322   : > { %v1129_v27 = vmul.f32 0.70710677, %v1127_v18  ;;  %v1130_v20 = vmul.f32 0.70710677, %v1128_v24  ;;  %v1163_v19 = vmul.f32 %v1161_v34, %v1125_v37  ;;  %v1164_v9 = vmul.f32 %v1162_v25, %v1126_v15 }
 0x323   : > { %v1157_v17 = vmul.f32 0.5, %v1127_v18  ;;  %v1158_v3 = vmul.f32 0.5, %v1128_v24 }
 0x324   : > { %v1131_v28 = vmul.f32 0.3275911, %v1129_v27  ;;  %v1132_v30 = vmul.f32 0.3275911, %v1130_v20  ;;  %v1165_v26 = vmul.f32 1.442695, %v1163_v19 }
 0x325   : > { %v1167_v49 = vmul.f32 1.442695, %v1164_v9 }
 0x326   : > { %v1133_v32 = vadd.f32 1.0, %v1131_v28  ;;  %v1134_v23 = vadd.f32 1.0, %v1132_v30  ;;  %v2548_v30 = vld [vmem:[%s3445_s6 + $0x40] sm:$0xff]  }
 0x327   : > { %2370 = vmatpush3.bf16.msra.mxu1 %v2548_v30 }
 0x328   : > { %2592 = vrcp.f32 %v1133_v32  ;;  %2371 = vmatprep.subr.bf16.mxu1 %v2691_v52  ;;  %v2549_v32 = vld [vmem:[%s3445_s6 + $0x48] sm:$0xff]  }
 0x329   : > { %2594 = vrcp.f32 %v1134_v23  ;;  %v2253_v23 = vld [vmem:[%s3441_s2 + $0x2] ss:$0 sm:$0xff] }
 0x32a   : > { %2596 = vpow2.f32 %v1165_v26 }
 0x32b   : > { %2598 = vpow2.f32 %v1167_v49  ;;  %2372 = vmatpush3.bf16.msra.mxu1 %v2549_v32 }
 0x32c   : > { %2373 = vmatprep.subr.bf16.mxu1 %v2691_v52 }
 0x332   : > { %v2593_v43 = vpop.eup %2592 }
 0x333   : > { %v2595_v21 = vpop.eup %2594  ;;  %v1137_v16 = vmul.f32 1.0614054, %v2593_v43 }
 0x334   : > { %v1138_v22 = vmul.f32 1.0614054, %v2595_v21  ;;  %v2597_v11 = vpop.eup %2596 }
 0x335   : > { %v2211_v45 = vadd.f32 -1.4531521, %v1137_v16  ;;  %v2599_v5 = vpop.eup %2598 }
 0x336   : > { %v2212_v10 = vadd.f32 -1.4531521, %v1138_v22 }
 0x337   : > { %v1141_v2 = vmul.f32 %v2593_v43, %v2211_v45 }
 0x338   : > { %v1142_v47 = vmul.f32 %v2595_v21, %v2212_v10 }
 0x339   : > { %v1143_v51 = vadd.f32 1.4214138, %v1141_v2 }
 0x33a   : > { %v1144_v54 = vadd.f32 1.4214138, %v1142_v47 }
 0x33b   : > { %v1145_v53 = vmul.f32 %v2593_v43, %v1143_v51 }
 0x33c   : > { %v1146_v56 = vmul.f32 %v2595_v21, %v1144_v54 }
 0x33d   : > { %v2213_v57 = vadd.f32 -0.28449672, %v1145_v53 }
 0x33e   : > { %v2214_v58 = vadd.f32 -0.28449672, %v1146_v56 }
 0x33f   : > { %v1149_v61 = vmul.f32 %v2593_v43, %v2213_v57 }
 0x340   : > { %v1150_v62 = vmul.f32 %v2595_v21, %v2214_v58 }
 0x341   : > { %v1151_v63 = vadd.f32 0.2548296, %v1149_v61 }
 0x342   : > { %v1152_v14 = vadd.f32 0.2548296, %v1150_v62 }
 0x343   : > { %v1153_v0 = vmul.f32 %v2593_v43, %v1151_v63 }
 0x344   : > { %v1154_v1 = vmul.f32 %v2595_v21, %v1152_v14 }
 0x345   : > { %v1159_v4 = vmul.f32 %v1157_v17, %v1153_v0 }
 0x346   : > { %v1160_v7 = vmul.f32 %v1158_v3, %v1154_v1 }
 0x347   : > { %v1169_v8 = vmul.f32 %v2597_v11, %v1159_v4 }
 0x348   : > { %v1170_v13 = vmul.f32 %v2599_v5, %v1160_v7 }
 0x349   : > { %v3190_v35 = vsub.f32 %v1155_v6, %v1169_v8 }
 0x34a   : > { %v3192_v36 = vsub.f32 %v1156_v12, %v1170_v13 }
 0x34c   : > { %v1258_v27 = vpack.c.bf16 %v3192_v36, %v3190_v35 }
 0x34e   : > { %1372 = vmatmul.mubr.bf16.vlgmr.msra.gmra.mrb[8].mxu0 %v1258_v27 }
 0x34f   : > { %2417 = vmatprep.mubr.msk.bf16.mxu0 %vm2692_vm0, %v2691_v52 }
 0x39b   : > { %v1015_v18 = vpop.f32.mrb[4].mxu0 }
 0x39c   : > { %v3199_v24 = vadd.f32 %v3101_v33, %v1015_v18  ;;  %v2355_v20 = vpop.f32.mrb[5].mxu0  ;;  %v2550_v33 = vld [vmem:[%s3445_s6 + $0x50] sm:$0xff]  }
 0x39d   : > { %v1018_v37 = vpop.f32.mrb[6].mxu0  ;;  %2374 = vmatpush3.bf16.msra.mxu1 %v2550_v33 }
 0x39e   : > { %v3202_v15 = vadd.f32 %v3103_v31, %v1018_v37  ;;  %v2356_v28 = vpop.f32.mrb[7].mxu0  ;;  %2375 = vmatprep.subr.bf16.mxu1 %v2691_v52  ;;  %v2551_v31 = vld [vmem:[%s3445_s6 + $0x58] sm:$0xff]  }
 0x3a1   : > { %2376 = vmatpush3.bf16.msra.mxu1 %v2551_v31 }
 0x3a2   : > { %2381 = vmatprep.subr.bf16.mxu1 %v2691_v52 }
 0x421   : > { %v3223_v34 = vpop.f32.mrb[8].mxu0 }
 0x422   : > { %1519 = vrot.lane.b32.xlu1 %v3223_v34, %s2690_s25  ;;  %v1375_v25 = vpop.f32.mrb[9].mxu0 }
 0x423   : > { %v1390_v43 = vadd.f32 %v2253_v23, %v1375_v25  ;;  %v3227_v21 = vpop.f32.mrb[10].mxu0 }
 0x424   : > { %1521 = vrot.lane.b32.xlu0 %v3227_v21, %s2690_s25  ;;  %v1379_v16 = vpop.f32.mrb[11].mxu0 }
 0x425   : > { %v1392_v22 = vand.u32 2147483647, %v1390_v43  ;;  %v1391_v19 = vadd.f32 %v2253_v23, %v1379_v16  ;;  %v1426_v51 = vmul.f32 -0.5, %v1390_v43  ;;  %v1420_v16 = vmax.f32 %v1390_v43, 0.0 }
 0x426   : > { %1523 = vrot.lane.b32.xlu1 %v3223_v34, %s2689_s18 }
 0x427   : > { %v1394_v9 = vmul.f32 0.70710677, %v1392_v22  ;;  %v1393_v45 = vand.u32 2147483647, %v1391_v19  ;;  %v1427_v53 = vmul.f32 -0.5, %v1391_v19  ;;  %v1428_v58 = vmul.f32 %v1426_v51, %v1390_v43  ;;  %v2554_v43 = vld [vmem:[%s3444_s5 + $0x10] sm:$0xff]  }
 0x428   : > { %1525 = vrot.lane.b32.xlu0 %v3227_v21, %s2689_s18  ;;  %v1422_v20 = vmul.f32 0.5, %v1392_v22  ;;  %v2553_v22 = vld [vmem:[%s3444_s5 + $0x8] sm:$0xff]  }
 0x429   : > { %v1396_v10 = vmul.f32 0.3275911, %v1394_v9  ;;  %v1395_v2 = vmul.f32 0.70710677, %v1393_v45  ;;  %v1429_v63 = vmul.f32 %v1427_v53, %v1391_v19  ;;  %v1430_v17 = vmul.f32 1.442695, %v1428_v58 }
 0x42a   : > { %v1423_v32 = vmul.f32 0.5, %v1393_v45  ;;  %v1421_v9 = vmax.f32 %v1391_v19, 0.0  ;;  %v2555_v19 = vld [vmem:[%s3444_s5 + $0x18] sm:$0xff]   ;;  %v2556_v45 = vld [vmem:[%s3444_s5 + $0x20] sm:$0xff]   ;;  %v2557_v51 = vld [vmem:[%s3444_s5 + $0x28] sm:$0xff]  }
 0x42b   : > { %v1398_v47 = vadd.f32 1.0, %v1396_v10  ;;  %v1397_v26 = vmul.f32 0.3275911, %v1395_v2  ;;  %v1432_v4 = vmul.f32 1.442695, %v1429_v63  ;;  %v2559_v53 = vld [vmem:[%s3444_s5 + $0x38] sm:$0xff]  }
 0x42d   : > { %2600 = vrcp.f32 %v1398_v47  ;;  %v1399_v49 = vadd.f32 1.0, %v1397_v26  ;;  %v2552_v26 = vld [vmem:[%s3444_s5] sm:$0xff]  }
 0x42f   : > { %2602 = vrcp.f32 %v1399_v49 }
 0x430   : > { %2604 = vpow2.f32 %v1430_v17 }
 0x431   : > { %2606 = vpow2.f32 %v1432_v4  ;;  %v2273_v4 = vld [vmem:[%s3442_s3 + $0x28] ss:$0 sm:$0xff] }
 0x437   : > { %v2601_v54 = vpop.eup %2600 }
 0x438   : > { %v1402_v56 = vmul.f32 1.0614054, %v2601_v54 }
 0x439   : > { %v2603_v57 = vpop.eup %2602 }
 0x43a   : > { %v2254_v61 = vadd.f32 -1.4531521, %v1402_v56  ;;  %v1403_v62 = vmul.f32 1.0614054, %v2603_v57  ;;  %v2605_v33 = vpop.eup %2604  ;;  %v2271_v56 = vld [vmem:[%s3442_s3 + $0x20] sm:$0xff] }
 0x43b   : > { %v2607_v25 = vpop.eup %2606  ;;  %v1574_v58 = vrot.slane %v2271_v56, %v2978_v42  ;;  %v1552_v17 = vrot.slane %v2271_v56, %v2992_v48 }
 0x43c   : > { %v1406_v14 = vmul.f32 %v2601_v54, %v2254_v61  ;;  %v2255_v0 = vadd.f32 -1.4531521, %v1403_v62  ;;  %v1536_v61 = vrot.slane %v2271_v56, %v2975_v41  ;;  %v1580_v62 = vrot.slane %v2271_v56, %v2984_v44 }
 0x43e   : > { %v1408_v1 = vadd.f32 1.4214138, %v1406_v14  ;;  %v1407_v3 = vmul.f32 %v2603_v57, %v2255_v0  ;;  %v1544_v0 = vrot.slane %v2271_v56, %v2988_v46 }
 0x440   : > { %v1410_v11 = vmul.f32 %v2601_v54, %v1408_v1  ;;  %v1409_v7 = vadd.f32 1.4214138, %v1407_v3 }
 0x442   : > { %v2256_v5 = vadd.f32 -0.28449672, %v1410_v11  ;;  %v1411_v6 = vmul.f32 %v2603_v57, %v1409_v7  ;;  %v1537_v11 = vmul.f32 %v1536_v61, %v3223_v34 }
 0x444   : > { %v1414_v8 = vmul.f32 %v2601_v54, %v2256_v5  ;;  %v2257_v12 = vadd.f32 -0.28449672, %v1411_v6  ;;  %v1558_v5 = vrot.slane %v2271_v56, %v2996_v50  ;;  %v1581_v6 = vmul.f32 %v1580_v62, %v3223_v34 }
 0x446   : > { %v1416_v13 = vadd.f32 0.2548296, %v1414_v8  ;;  %v1415_v27 = vmul.f32 %v2603_v57, %v2257_v12  ;;  %v1566_v12 = vrot.slane %v2271_v56, %v3000_v55 }
 0x448   : > { %v1418_v18 = vmul.f32 %v2601_v54, %v1416_v13  ;;  %v1417_v37 = vadd.f32 0.2548296, %v1415_v27  ;;  %v2558_v54 = vld [vmem:[%s3444_s5 + $0x30] sm:$0xff]  }
 0x44a   : > { %v1424_v28 = vmul.f32 %v1422_v20, %v1418_v18  ;;  %v1419_v30 = vmul.f32 %v2603_v57, %v1417_v37  ;;  %v1530_v57 = vrot.slane %v2271_v56, %v2968_v38  ;;  %v1538_v18 = vmul.f32 %v1536_v61, %v3227_v21 }
 0x44c   : > { %v1434_v31 = vmul.f32 %v2605_v33, %v1424_v28  ;;  %v1425_v23 = vmul.f32 %v1423_v32, %v1419_v30  ;;  %v1582_v32 = vmul.f32 %v1580_v62, %v3227_v21 }
 0x44e   : > { %v1435_v10 = vmul.f32 %v2607_v25, %v1425_v23  ;;  %v1436_v2 = vsub.f32 %v1420_v16, %v1434_v31 }
 0x450   : > { %v1437_v47 = vsub.f32 %v1421_v9, %v1435_v10  ;;  %v1559_v9 = vmul.f32 %v1558_v5, %v3223_v34 }
 0x452   : > { %v1438_v49 = vpack.c.bf16 %v1437_v47, %v1436_v2 }
 0x454   : > { %2378 = vmatmul.mubr.msk.bf16.vlgmr.msra.gmra.mrb[8].mxu1 %vm977_vm3, %v1438_v49 }
 0x455   : > { %2382 = vmatpush3.bf16.msra.mxu1 %v2552_v26  ;;  %2397 = vmatprep.mubr.msk.bf16.mxu1 %vm2692_vm0, %v2691_v52  ;;  %v1560_v26 = vmul.f32 %v1558_v5, %v3227_v21 }
 0x456   : > { %2383 = vmatprep.subr.bf16.mxu1 %v2691_v52 }
 0x459   : > { %2384 = vmatpush3.bf16.msra.mxu1 %v2553_v22 }
 0x45a   : > { %2385 = vmatprep.subr.bf16.mxu1 %v2691_v52 }
 0x45d   : > { %2386 = vmatpush3.bf16.msra.mxu1 %v2554_v43 }
 0x45e   : > { %2387 = vmatprep.subr.bf16.mxu1 %v2691_v52 }
 0x461   : > { %2388 = vmatpush3.bf16.msra.mxu1 %v2555_v19 }
 0x462   : > { %2389 = vmatprep.subr.bf16.mxu1 %v2691_v52 }
 0x465   : > { %2390 = vmatpush3.bf16.msra.mxu1 %v2556_v45 }
 0x466   : > { %2391 = vmatprep.subr.bf16.mxu1 %v2691_v52 }
 0x469   : > { %2392 = vmatpush3.bf16.msra.mxu1 %v2557_v51 }
 0x46a   : > { %2393 = vmatprep.subr.bf16.mxu1 %v2691_v52 }
 0x46d   : > { %2394 = vmatpush3.bf16.msra.mxu1 %v2558_v54 }
 0x46e   : > { %2395 = vmatprep.subr.bf16.mxu1 %v2691_v52 }
 0x471   : > { %2396 = vmatpush3.bf16.msra.mxu1 %v2559_v53 }
 0x494   : > { %v1520_v63 = vpop.permute.xlu1 %1519 }
 0x495   : > { %v1531_v14 = vmul.f32 %v1530_v57, %v1520_v63  ;;  %v1575_v1 = vmul.f32 %v1574_v58, %v1520_v63  ;;  %v1553_v28 = vmul.f32 %v1552_v17, %v1520_v63 }
 0x496   : > { %v1522_v3 = vpop.permute.xlu0 %1521 }
 0x497   : > { %v1532_v7 = vmul.f32 %v1530_v57, %v1522_v3  ;;  %v1576_v8 = vmul.f32 %v1574_v58, %v1522_v3  ;;  %v1539_v27 = vadd.f32 %v1537_v11, %v1531_v14  ;;  %v1583_v30 = vadd.f32 %v1581_v6, %v1575_v1  ;;  %v2275_v11 = vld [vmem:[%s3443_s4 + $0x2] ss:$0 sm:$0xff] }
 0x498   : > { %v1524_v13 = vpop.permute.xlu1 %1523  ;;  %v1554_v23 = vmul.f32 %v1552_v17, %v1522_v3  ;;  %v1561_v45 = vadd.f32 %v1559_v9, %v1553_v28 }
 0x499   : > { %v1545_v20 = vmul.f32 %v1544_v0, %v1524_v13  ;;  %v1589_v37 = vmul.f32 %v2273_v4, %v1524_v13  ;;  %v1540_v31 = vadd.f32 %v1538_v18, %v1532_v7  ;;  %v1584_v10 = vadd.f32 %v1582_v32, %v1576_v8 }
 0x49a   : > { %v1526_v33 = vpop.permute.xlu0 %1525  ;;  %v1567_v49 = vmul.f32 %v1566_v12, %v1524_v13  ;;  %v1562_v51 = vadd.f32 %v1560_v26, %v1554_v23 }
 0x49b   : > { %v1547_v25 = vadd.f32 %v1545_v20, %v1539_v27  ;;  %v1546_v16 = vmul.f32 %v1544_v0, %v1526_v33  ;;  %v1591_v2 = vadd.f32 %v1589_v37, %v1583_v30  ;;  %v1590_v47 = vmul.f32 %v2273_v4, %v1526_v33 }
 0x49c   : > { %v1568_v43 = vmul.f32 %v1566_v12, %v1526_v33  ;;  %v1569_v58 = vadd.f32 %v1567_v49, %v1561_v45 }
 0x49d   : > { %v1548_v22 = vadd.f32 %v1546_v16, %v1540_v31  ;;  %v1592_v19 = vadd.f32 %v1590_v47, %v1584_v10  ;;  %v1593_v54 = vrot.slane %v1547_v25, 7  ;;  %v1601_v56 = vrot.slane %v1591_v2, 1 }
 0x49e   : > { %v1570_v61 = vadd.f32 %v1568_v43, %v1562_v51 }
 0x49f   : > { %v1594_v53 = vrot.slane %v1548_v22, 7  ;;  %v1602_v57 = vrot.slane %v1592_v19, 1 }
 0x4a1   : > { %v1595_v34 = vsel %vm648_vm1, %v1593_v54, %v1594_v53  ;;  %v1596_v62 = vsel %vm648_vm1, %v1594_v53, %v1593_v54  ;;  %v1603_v14 = vsel %vm669_vm2, %v1601_v56, %v1602_v57  ;;  %v1604_v0 = vsel %vm669_vm2, %v1602_v57, %v1601_v56 }
 0x4a2   : > { %v1597_v21 = vmul.f32 %v1596_v62, %v2972_v40  ;;  %v1598_v63 = vmul.f32 %v1595_v34, %v2970_v39  ;;  %v1605_v3 = vmul.f32 %v1603_v14, %v3027_v59  ;;  %v1606_v4 = vmul.f32 %v1604_v0, %v3029_v60 }
 0x4a4   : > { %v1599_v17 = vadd.f32 %v1597_v21, %v1569_v58  ;;  %v1600_v1 = vadd.f32 %v1598_v63, %v1570_v61 }
 0x4a6   : > { %v1607_v7 = vadd.f32 %v1605_v3, %v1599_v17  ;;  %v1608_v5 = vadd.f32 %v1606_v4, %v1600_v1 }
 0x4a8   : > { %v1617_v6 = vadd.f32 %v2275_v11, %v1607_v7  ;;  %v1618_v8 = vadd.f32 %v2275_v11, %v1608_v5 }
 0x4aa   : > { %v1619_v12 = vadd.f32 %v1617_v6, %v3190_v35  ;;  %v1620_v13 = vadd.f32 %v1618_v8, %v3192_v36 }
 0x4ac   : > { %v1621_v27 = vand.u32 2147483647, %v1619_v12  ;;  %v1622_v18 = vand.u32 2147483647, %v1620_v13  ;;  %v1655_v31 = vmul.f32 -0.5, %v1619_v12  ;;  %v1656_v23 = vmul.f32 -0.5, %v1620_v13 }
 0x4ad   : > { %v1649_v4 = vmax.f32 %v1619_v12, 0.0  ;;  %v1650_v7 = vmax.f32 %v1620_v13, 0.0 }
 0x4ae   : > { %v1623_v20 = vmul.f32 0.70710677, %v1621_v27  ;;  %v1624_v37 = vmul.f32 0.70710677, %v1622_v18  ;;  %v1657_v2 = vmul.f32 %v1655_v31, %v1619_v12  ;;  %v1658_v35 = vmul.f32 %v1656_v23, %v1620_v13  ;;  %v2562_v23 = vld [vmem:[%s3446_s7 + $0x10] sm:$0xff]  }
 0x4af   : > { %v1651_v21 = vmul.f32 0.5, %v1621_v27  ;;  %v1652_v14 = vmul.f32 0.5, %v1622_v18 }
 0x4b0   : > { %v1625_v28 = vmul.f32 0.3275911, %v1623_v20  ;;  %v1626_v30 = vmul.f32 0.3275911, %v1624_v37  ;;  %v1659_v22 = vmul.f32 1.442695, %v1657_v2 }
 0x4b1   : > { %v1661_v43 = vmul.f32 1.442695, %v1658_v35  ;;  %v2567_v2 = vld [vmem:[%s3446_s7 + $0x38] sm:$0xff]   ;;  %v2288_v35 = vld [vmem:[%s3442_s3 + $0x30] sm:$0xff] }
 0x4b2   : > { %v1627_v32 = vadd.f32 1.0, %v1625_v28  ;;  %v1628_v33 = vadd.f32 1.0, %v1626_v30 }
 0x4b4   : > { %2608 = vrcp.f32 %v1627_v32 }
 0x4b5   : > { %2610 = vrcp.f32 %v1628_v33 }
 0x4b6   : > { %2612 = vpow2.f32 %v1659_v22 }
 0x4b7   : > { %2614 = vpow2.f32 %v1661_v43 }
 0x4be   : > { %v2609_v25 = vpop.eup %2608 }
 0x4bf   : > { %v2611_v16 = vpop.eup %2610  ;;  %v1631_v9 = vmul.f32 1.0614054, %v2609_v25 }
 0x4c0   : > { %v1632_v10 = vmul.f32 1.0614054, %v2611_v16  ;;  %v2613_v17 = vpop.eup %2612 }
 0x4c1   : > { %v2276_v47 = vadd.f32 -1.4531521, %v1631_v9  ;;  %v2615_v3 = vpop.eup %2614  ;;  %v2565_v9 = vld [vmem:[%s3446_s7 + $0x28] sm:$0xff]  }
 0x4c2   : > { %v2277_v36 = vadd.f32 -1.4531521, %v1632_v10  ;;  %v2566_v10 = vld [vmem:[%s3446_s7 + $0x30] sm:$0xff]  }
 0x4c3   : > { %v1635_v26 = vmul.f32 %v2609_v25, %v2276_v47  ;;  %v1789_v47 = vrot.slane %v2288_v35, %v2968_v38 }
 0x4c4   : > { %v1636_v49 = vmul.f32 %v2611_v16, %v2277_v36  ;;  %v1833_v36 = vrot.slane %v2288_v35, %v2978_v42  ;;  %v1817_v42 = vrot.slane %v2288_v35, %v2996_v50 }
 0x4c5   : > { %v1637_v19 = vadd.f32 1.4214138, %v1635_v26  ;;  %v1795_v26 = vrot.slane %v2288_v35, %v2975_v41 }
 0x4c6   : > { %v1638_v45 = vadd.f32 1.4214138, %v1636_v49  ;;  %v1839_v49 = vrot.slane %v2288_v35, %v2984_v44  ;;  %v1825_v44 = vrot.slane %v2288_v35, %v3000_v55 }
 0x4c7   : > { %v1639_v51 = vmul.f32 %v2609_v25, %v1637_v19  ;;  %v1803_v19 = vrot.slane %v2288_v35, %v2988_v46 }
 0x4c8   : > { %v1640_v54 = vmul.f32 %v2611_v16, %v1638_v45  ;;  %v1811_v45 = vrot.slane %v2288_v35, %v2992_v48 }
 0x4c9   : > { %v2278_v53 = vadd.f32 -0.28449672, %v1639_v51 }
 0x4ca   : > { %v2279_v56 = vadd.f32 -0.28449672, %v1640_v54  ;;  %v2290_v54 = vld [vmem:[%s3442_s3 + $0x38] ss:$0 sm:$0xff] }
 0x4cb   : > { %v1643_v57 = vmul.f32 %v2609_v25, %v2278_v53 }
 0x4cc   : > { %v1644_v58 = vmul.f32 %v2611_v16, %v2279_v56 }
 0x4cd   : > { %v1645_v61 = vadd.f32 0.2548296, %v1643_v57 }
 0x4ce   : > { %v1646_v34 = vadd.f32 0.2548296, %v1644_v58 }
 0x4cf   : > { %v1647_v62 = vmul.f32 %v2609_v25, %v1645_v61  ;;  %v2563_v25 = vld [vmem:[%s3446_s7 + $0x18] sm:$0xff]  }
 0x4d0   : > { %v1648_v63 = vmul.f32 %v2611_v16, %v1646_v34  ;;  %v2564_v16 = vld [vmem:[%s3446_s7 + $0x20] sm:$0xff]  }
 0x4d1   : > { %v1653_v0 = vmul.f32 %v1651_v21, %v1647_v62 }
 0x4d2   : > { %v1654_v1 = vmul.f32 %v1652_v14, %v1648_v63 }
 0x4d3   : > { %v1663_v11 = vmul.f32 %v2613_v17, %v1653_v0 }
 0x4d4   : > { %v1664_v5 = vmul.f32 %v2615_v3, %v1654_v1 }
 0x4d5   : > { %v1665_v6 = vsub.f32 %v1649_v4, %v1663_v11 }
 0x4d6   : > { %v1666_v8 = vsub.f32 %v1650_v7, %v1664_v5 }
 0x4d8   : > { %v1685_v20 = vpack.c.bf16 %v1666_v8, %v1665_v6 }
 0x4da   : > { %2398 = vmatmul.mubr.bf16.vlgmr.msra.gmra.mrb[12].mxu1 %v1685_v20 }
 0x527   : > { %v1509_v37 = vpop.f32.mrb[8].mxu1 }
 0x528   : > { %v3307_v28 = vadd.f32 %v1509_v37, %v3199_v24  ;;  %v2379_v30 = vpop.f32.mrb[9].mxu1  ;;  %v2560_v24 = vld [vmem:[%s3446_s7] sm:$0xff]  }
 0x529   : > { %v1512_v27 = vpop.f32.mrb[10].mxu1  ;;  %2402 = vmatpush3.bf16.msra.mxu0 %v2560_v24 }
 0x52a   : > { %v3310_v18 = vadd.f32 %v1512_v27, %v3202_v15  ;;  %v2380_v32 = vpop.f32.mrb[11].mxu1  ;;  %v2561_v15 = vld [vmem:[%s3446_s7 + $0x8] sm:$0xff]   ;;  %2403 = vmatprep.subr.bf16.mxu0 %v2691_v52 }
 0x52d   : > { %2404 = vmatpush3.bf16.msra.mxu0 %v2561_v15 }
 0x52e   : > { %2405 = vmatprep.subr.bf16.mxu0 %v2691_v52 }
 0x531   : > { %2406 = vmatpush3.bf16.msra.mxu0 %v2562_v23 }
 0x532   : > { %2407 = vmatprep.subr.bf16.mxu0 %v2691_v52 }
 0x535   : > { %2408 = vmatpush3.bf16.msra.mxu0 %v2563_v25 }
 0x536   : > { %2409 = vmatprep.subr.bf16.mxu0 %v2691_v52 }
 0x539   : > { %2410 = vmatpush3.bf16.msra.mxu0 %v2564_v16 }
 0x53a   : > { %2411 = vmatprep.subr.bf16.mxu0 %v2691_v52 }
 0x53d   : > { %2412 = vmatpush3.bf16.msra.mxu0 %v2565_v9 }
 0x53e   : > { %2413 = vmatprep.subr.bf16.mxu0 %v2691_v52 }
 0x541   : > { %2414 = vmatpush3.bf16.msra.mxu0 %v2566_v10 }
 0x542   : > { %2415 = vmatprep.subr.bf16.mxu0 %v2691_v52 }
 0x545   : > { %2416 = vmatpush3.bf16.msra.mxu0 %v2567_v2 }
 0x5ad   : > { %v1768_v33 = vpop.f32.mrb[12].mxu1 }
 0x5ae   : > { %1778 = vrot.lane.b32.xlu1 %v1768_v33, %s2690_s25  ;;  %v2399_v12 = vpop.f32.mrb[13].mxu1  ;;  %v1796_v53 = vmul.f32 %v1795_v26, %v1768_v33  ;;  %v1840_v56 = vmul.f32 %v1839_v49, %v1768_v33  ;;  %v1818_v50 = vmul.f32 %v1817_v42, %v1768_v33 }
 0x5af   : > { %v3313_v13 = vpop.f32.mrb[14].mxu1 }
 0x5b0   : > { %1780 = vrot.lane.b32.xlu0 %v3313_v13, %s2690_s25  ;;  %v2400_v31 = vpop.f32.mrb[15].mxu1  ;;  %v1797_v46 = vmul.f32 %v1795_v26, %v3313_v13  ;;  %v1841_v21 = vmul.f32 %v1839_v49, %v3313_v13  ;;  %v1819_v55 = vmul.f32 %v1817_v42, %v3313_v13 }
 0x5b2   : > { %1782 = vrot.lane.b32.xlu1 %v1768_v33, %s2689_s18 }
 0x5b4   : > { %1784 = vrot.lane.b32.xlu0 %v3313_v13, %s2689_s18  ;;  %s2311_s18 = sshll.u32 %s2771_s17, 8  ;;  %s2624_s17 = scalar_lea.vmem %s3390_s11, 256 }
 0x5b5   : > { %s3395_s20 = scalar_lea.hbm %s3449_s10, %s2311_s18  ;;  %p2625_p11 = scmp.ne.s32.totalorder %s3390_s11, %s2624_s17 }
 0x5b6   : > { %p2632_p1 = scmp.lt.s32.totalorder %s2630_s29, %s2624_s17 }
 0x5b7   : > { %p2626_p12 = pnand %p2625_p11, %p2788_p5 }
 0x5b8   : > { %p2633_p2 = por %p2632_p1, %p2631_p0 }
 0x5b9   : > { %p2627_p13 = pneg %p2626_p12 }
 0x5bb   : > { %p2634_p3 = pnand %p2633_p2, %p2627_p13 }
 0x620   : > { %v1779_v22 = vpop.permute.xlu1 %1778 }
 0x621   : > { %v1790_v43 = vmul.f32 %v1789_v47, %v1779_v22  ;;  %v1834_v52 = vmul.f32 %v1833_v36, %v1779_v22  ;;  %v1812_v34 = vmul.f32 %v1811_v45, %v1779_v22 }
 0x622   : > { %v1781_v51 = vpop.permute.xlu0 %1780 }
 0x623   : > { %v1791_v38 = vmul.f32 %v1789_v47, %v1781_v51  ;;  %v1835_v41 = vmul.f32 %v1833_v36, %v1781_v51  ;;  %v1798_v58 = vadd.f32 %v1796_v53, %v1790_v43  ;;  %v1842_v62 = vadd.f32 %v1840_v56, %v1834_v52  ;;  %v2292_v47 = vld [vmem:[%s3443_s4 + $0x3] ss:$0 sm:$0xff] }
 0x624   : > { %v1783_v57 = vpop.permute.xlu1 %1782  ;;  %v1813_v0 = vmul.f32 %v1811_v45, %v1781_v51  ;;  %v1820_v20 = vadd.f32 %v1818_v50, %v1812_v34 }
 0x625   : > { %v1804_v61 = vmul.f32 %v1803_v19, %v1783_v57  ;;  %v1848_v48 = vmul.f32 %v2290_v54, %v1783_v57  ;;  %v1799_v14 = vadd.f32 %v1797_v46, %v1791_v38  ;;  %v1843_v3 = vadd.f32 %v1841_v21, %v1835_v41 }
 0x626   : > { %v1785_v63 = vpop.permute.xlu0 %1784  ;;  %v1826_v7 = vmul.f32 %v1825_v44, %v1783_v57  ;;  %v1821_v37 = vadd.f32 %v1819_v55, %v1813_v0 }
 0x627   : > { %v1806_v17 = vadd.f32 %v1804_v61, %v1798_v58  ;;  %v1805_v1 = vmul.f32 %v1803_v19, %v1785_v63  ;;  %v1850_v4 = vadd.f32 %v1848_v48, %v1842_v62  ;;  %v1849_v11 = vmul.f32 %v2290_v54, %v1785_v63 }
 0x628   : > { %v1827_v6 = vmul.f32 %v1825_v44, %v1785_v63  ;;  %v1828_v31 = vadd.f32 %v1826_v7, %v1820_v20 }
 0x629   : > { %v1807_v5 = vadd.f32 %v1805_v1, %v1799_v14  ;;  %v1851_v8 = vadd.f32 %v1849_v11, %v1843_v3  ;;  %v1852_v30 = vrot.slane %v1806_v17, 7  ;;  %v1860_v32 = vrot.slane %v1850_v4, 1 }
 0x62a   : > { %v1829_v24 = vadd.f32 %v1827_v6, %v1821_v37 }
 0x62b   : > { %v1853_v27 = vrot.slane %v1807_v5, 7  ;;  %v1861_v12 = vrot.slane %v1851_v8, 1 }
 0x62d   : > { %v1854_v33 = vsel %vm648_vm1, %v1852_v30, %v1853_v27  ;;  %v1855_v15 = vsel %vm648_vm1, %v1853_v27, %v1852_v30  ;;  %v1862_v25 = vsel %vm669_vm2, %v1860_v32, %v1861_v12  ;;  %v1863_v16 = vsel %vm669_vm2, %v1861_v12, %v1860_v32 }
 0x62e   : > { %v1856_v13 = vmul.f32 %v1855_v15, %v2972_v40  ;;  %v1857_v23 = vmul.f32 %v1854_v33, %v2970_v39  ;;  %v1864_v2 = vmul.f32 %v1862_v25, %v3027_v59  ;;  %v1865_v35 = vmul.f32 %v1863_v16, %v3029_v60  ;;  %v2305_v15 = vld [vmem:[%s3447_s8] ss:$0 sm:$0xff] }
 0x630   : > { %v1858_v9 = vadd.f32 %v1856_v13, %v1828_v31  ;;  %v1859_v10 = vadd.f32 %v1857_v23, %v1829_v24 }
 0x632   : > { %v1866_v36 = vadd.f32 %v1864_v2, %v1858_v9  ;;  %v1867_v40 = vadd.f32 %v1865_v35, %v1859_v10 }
 0x634   : > { %v1876_v26 = vadd.f32 %v2292_v47, %v1866_v36  ;;  %v1877_v39 = vadd.f32 %v2292_v47, %v1867_v40 }
 0x636   : > { %v1878_v49 = vand.u32 2147483647, %v1876_v26  ;;  %v1879_v22 = vand.u32 2147483647, %v1877_v39  ;;  %v1912_v59 = vmul.f32 -0.5, %v1876_v26  ;;  %v1913_v60 = vmul.f32 -0.5, %v1877_v39 }
 0x637   : > { %v1906_v37 = vmax.f32 %v1876_v26, 0.0  ;;  %v1907_v27 = vmax.f32 %v1877_v39, 0.0 }
 0x638   : > { %v1880_v43 = vmul.f32 0.70710677, %v1878_v49  ;;  %v1881_v19 = vmul.f32 0.70710677, %v1879_v22  ;;  %v1914_v42 = vmul.f32 %v1912_v59, %v1876_v26  ;;  %v1915_v41 = vmul.f32 %v1913_v60, %v1877_v39 }
 0x639   : > { %v1908_v11 = vmul.f32 0.5, %v1878_v49  ;;  %v1909_v7 = vmul.f32 0.5, %v1879_v22 }
 0x63a   : > { %v1882_v29 = vmul.f32 0.3275911, %v1880_v43  ;;  %v1883_v45 = vmul.f32 0.3275911, %v1881_v19  ;;  %v1916_v46 = vmul.f32 1.442695, %v1914_v42 }
 0x63b   : > { %v1918_v48 = vmul.f32 1.442695, %v1915_v41 }
 0x63c   : > { %v1884_v52 = vadd.f32 1.0, %v1882_v29  ;;  %v1885_v51 = vadd.f32 1.0, %v1883_v45 }
 0x63e   : > { %2616 = vrcp.f32 %v1884_v52 }
 0x63f   : > { %2618 = vrcp.f32 %v1885_v51 }
 0x640   : > { %2620 = vpow2.f32 %v1916_v46 }
 0x641   : > { %2622 = vpow2.f32 %v1918_v48 }
 0x648   : > { %v2617_v54 = vpop.eup %2616 }
 0x649   : > { %v2619_v53 = vpop.eup %2618  ;;  %v1888_v38 = vmul.f32 1.0614054, %v2617_v54 }
 0x64a   : > { %v1889_v56 = vmul.f32 1.0614054, %v2619_v53  ;;  %v2621_v6 = vpop.eup %2620 }
 0x64b   : > { %v2293_v44 = vadd.f32 -1.4531521, %v1888_v38  ;;  %v2623_v20 = vpop.eup %2622 }
 0x64c   : > { %v2294_v57 = vadd.f32 -1.4531521, %v1889_v56 }
 0x64d   : > { %v1892_v58 = vmul.f32 %v2617_v54, %v2293_v44 }
 0x64e   : > { %v1893_v61 = vmul.f32 %v2619_v53, %v2294_v57 }
 0x64f   : > { %v1894_v34 = vadd.f32 1.4214138, %v1892_v58 }
 0x650   : > { %v1895_v62 = vadd.f32 1.4214138, %v1893_v61 }
 0x651   : > { %v1896_v21 = vmul.f32 %v2617_v54, %v1894_v34 }
 0x652   : > { %v1897_v63 = vmul.f32 %v2619_v53, %v1895_v62 }
 0x653   : > { %v2295_v14 = vadd.f32 -0.28449672, %v1896_v21 }
 0x654   : > { %v2296_v0 = vadd.f32 -0.28449672, %v1897_v63 }
 0x655   : > { %v1900_v17 = vmul.f32 %v2617_v54, %v2295_v14 }
 0x656   : > { %v1901_v1 = vmul.f32 %v2619_v53, %v2296_v0 }
 0x657   : > { %v1902_v50 = vadd.f32 0.2548296, %v1900_v17 }
 0x658   : > { %v1903_v3 = vadd.f32 0.2548296, %v1901_v1 }
 0x659   : > { %v1904_v4 = vmul.f32 %v2617_v54, %v1902_v50 }
 0x65a   : > { %v1905_v55 = vmul.f32 %v2619_v53, %v1903_v3 }
 0x65b   : > { %v1910_v5 = vmul.f32 %v1908_v11, %v1904_v4 }
 0x65c   : > { %v1911_v8 = vmul.f32 %v1909_v7, %v1905_v55 }
 0x65d   : > { %v1920_v30 = vmul.f32 %v2621_v6, %v1910_v5 }
 0x65e   : > { %v1921_v32 = vmul.f32 %v2623_v20, %v1911_v8 }
 0x65f   : > { %v1922_v12 = vsub.f32 %v1906_v37, %v1920_v30 }
 0x660   : > { %v1923_v31 = vsub.f32 %v1907_v27, %v1921_v32 }
 0x662   : > { %v1924_v24 = vpack.c.bf16 %v1923_v31, %v1922_v12 }
 0x664   : > { %2418 = vmatmul.mubr.bf16.vlgmr.msra.gmra.mrb[12].mxu0 %v1924_v24 }
 0x737   : > { %v2023_v33 = vpop.f32.mrb[12].mxu0 }
 0x738   : > { %v2030_v13 = vadd.f32 %v2023_v33, %v3307_v28  ;;  %v2419_v23 = vpop.f32.mrb[13].mxu0 }
 0x739   : > { %v2026_v25 = vpop.f32.mrb[14].mxu0 }
 0x73a   : > { %v2039_v16 = vadd.f32 %v2305_v15, %v2030_v13  ;;  %v2031_v9 = vadd.f32 %v2026_v25, %v3310_v18  ;;  %v2420_v10 = vpop.f32.mrb[15].mxu0 }
 0x73c   : > { %2041 = vst [vmem:[%s353_s30] sm:$0xff] %v2039_v16  ;;  %v2040_v2 = vadd.f32 %v2305_v15, %v2031_v9 }
 0x73e   : > { %2042 = vst [vmem:[%s353_s30 + $0x8] sm:$0xff] %v2040_v2 }
 0x73f   : > { %2637 = shalt.err (!%p2634_p3)
}
 0x740   : > { %s2638_s26 = scalar_lea.hbm %s3395_s20, 256  ;;  %s2642_s21 = scalar_lea.hbm %s3449_s10, 512 }
 0x741   : > { %p2639_p4 = scmp.ne.s32.totalorder %s3395_s20, %s2638_s26  ;;  %p2643_p9 = scmp.lt.u32.totalorder %s3395_s20, %s3449_s10 }
 0x742   : > { %p2644_p10 = scmp.lt.u32.totalorder %s2642_s21, %s2638_s26  ;;  %p2646_p12 = scmp.lt.u32.totalorder %s2638_s26, %s3395_s20 }
 0x743   : > { %p2640_p7 = pnand %p2639_p4, %p2788_p5 }
 0x744   : > { %p2645_p11 = por %p2644_p10, %p2643_p9 }
 0x745   : > { %p2641_p8 = pneg %p2640_p7 }
 0x746   : > { %p2647_p13 = por %p2646_p12, %p2645_p11 }
 0x748   : > { %p2648_p0 = pnand %p2647_p13, %p2641_p8 }
 0x74a   : > { %2651 = shalt.err (!%p2648_p0)
}
 0x74b   : > { %s2694_s17 = smov 128  }
 0x74c   : > { %2421 = dma.vmem_to_hbm [thread:$0]  (%p2788_p5), %s3390_s11, 256, %s3395_s20, %s3397_s22, %s2694_s17, %s2694_s17, %s2690_s25  }
 0x74d PF: > { %p2427_p1 = scmp.ge.s32.totalorder %s2686_s16, 2  ;;  %s2072_s28 = sand.u32 1, %s2674_s13  }
 0x74e   : > { %s2073_s29 = scalar_lea.sflag [#allocation3], %s2072_s28 }
 0x74f   : > { %p2424_p2 = pnand %p2427_p1, %p2792_p6 }
 0x751   : > { %2669 = dma.done.wait (!%p2424_p2), %s2073_s29, 256  }
 0x752   : > { %2671 = vsyncadd (!%p2424_p2), %s2073_s29, 4294967040  ;;  %s3453_s23 = sld [smem:[#allocation5_spill]]  ;;  %p20_p3 = scmp.ge.s32.totalorder %s2775_s19, 4  }
 0x753   : > { %s3454_s13 = smov %s2678_s14  ;;  %s3455_s14 = smov %s2682_s15 }
 0x754   : > { %s3457_s16 = smov %s2775_s19  ;;  %22 = sbr.rel (!%p20_p3) target bundleno = 3 (0x3), region = 108 }
 0x758   : > { %s3456_s15 = smov %s3453_s23 }
 0x75b   :  { %2078 = vsyncpa [#allocation3], 1 }
 0x75c   :  { %2080 = vsyncpa [#allocation3 + $0x1], 1 }

</bundles_post_ra>
